<compile_context>
chip_gen: v6e
topology: v6e:2x2x1
jax: 0.10.0
libtpu: 0.0.40
codegen_flags: <defaults>
</compile_context>

<pallas_src>
import functools

import jax
import jax.numpy as jnp
from jax.experimental import pallas as pl
from jax.experimental.pallas import tpu as pltpu


# Lane/sublane-aligned padded dims used inside the kernel.
_HIDDEN_PAD = 128   # true hidden = 100
_LATENT_PAD = 8     # true latent = 3


def _softplus(x):
    # Numerically-stable softplus from exp/log only (both lower cleanly on Mosaic).
    return jnp.maximum(x, 0.0) + jnp.log(1.0 + jnp.exp(-jnp.abs(x)))


def _vae_kernel(
    x_ref, ksi_ref,
    w1_ref, b1_ref, w2_ref, b2_ref,
    wms_ref, bms_ref,                      # fused mu||sigma head
    w3_ref, b3_ref, w4_ref, b4_ref, w5_ref, b5_ref,
    recon_ref, musig_ref,
    *, eps, latent_pad,
):
    """Fused VAE forward for one batch tile."""
    mx = w1_ref.dtype   # MXU operand dtype (bf16 fast path, f32 exact path)

    x = x_ref[...].astype(mx)

    # --- encoder: Linear+ReLU, Linear+ReLU (bf16 MXU, f32 accumulate) ---
    h = jnp.dot(x, w1_ref[...], preferred_element_type=jnp.float32) + b1_ref[...]
    h = jnp.maximum(h, 0.0)
    h = jnp.dot(h.astype(mx), w2_ref[...], preferred_element_type=jnp.float32) + b2_ref[...]
    h = jnp.maximum(h, 0.0)

    # --- fused latent heads: one (bb, 2*latent_pad) matmul, slice halves ---
    ms = jnp.dot(h.astype(mx), wms_ref[...], preferred_element_type=jnp.float32) + bms_ref[...]
    mu = ms[:, :latent_pad]
    sigma = _softplus(ms[:, latent_pad:]) + eps

    # --- reparametrize: z = ksi * exp(0.5 * sigma) + mu ---
    std = jnp.exp(0.5 * sigma)
    z = ksi_ref[...] * std + mu

    # --- decoder: Linear+ReLU, Linear+ReLU, Linear+Tanh ---
    d = jnp.dot(z.astype(mx), w3_ref[...], preferred_element_type=jnp.float32) + b3_ref[...]
    d = jnp.maximum(d, 0.0)
    d = jnp.dot(d.astype(mx), w4_ref[...], preferred_element_type=jnp.float32) + b4_ref[...]
    d = jnp.maximum(d, 0.0)
    d = jnp.dot(d.astype(mx), w5_ref[...], preferred_element_type=jnp.float32) + b5_ref[...]

    recon_ref[...] = jnp.tanh(d).astype(recon_ref.dtype)
    # Packed mu||sigma output: one (bb, 2*latent_pad) store instead of two
    # (bb, latent_pad) lane-sparse masked-store streams.
    musig_ref[...] = jnp.concatenate([mu, sigma], axis=-1).astype(musig_ref.dtype)


def _full_spec(shape):
    # Weight / bias tensors: one block covering the whole array, replicated
    # over the batch-tile grid axis (constant index_map -> stays VMEM-resident).
    ndim = len(shape)
    return pl.BlockSpec(shape, lambda i: (0,) * ndim)


def _num_tensorcores():
    """Best-effort TensorCores-per-chip (v7x = 2, v5e/v6e = 1).  Perf-only."""
    try:
        info = pltpu.get_tpu_info()
        for attr in ("num_tensorcores", "tensorcores_per_chip"):
            n = getattr(info, attr, None)
            if isinstance(n, int) and 1 <= n <= 4:
                return n
    except Exception:
        pass
    try:
        kind = jax.devices()[0].device_kind.lower()
        if "v7" in kind or "7x" in kind:
            return 2
    except Exception:
        pass
    return 1


def _round_up(n, m):
    return pl.cdiv(n, m) * m


def _choose_block_b(batch, requested, num_cores):
    # Largest sublane-aligned tile covering the batch (single-TC chips never
    # benefit from extra grid steps: the grid is a serial loop there).
    bb = min(max(8, requested), _round_up(max(batch, 1), 8))
    bb = max(8, (bb // 8) * 8)
    if num_cores > 1:
        # v7x: aim for >= 2 grid steps per core so each core's x/recon DMA
        # overlaps its matmul chain; never shrink the MXU M-dim below 128.
        target_steps = 2 * num_cores
        while pl.cdiv(batch, bb) < target_steps and bb > 128:
            bb = max(128, ((bb // 2) // 8) * 8)
    return bb


@functools.partial(jax.jit, static_argnames=("latent_dims", "eps", "block_b"))
def vae_forward(x, ksi, params, latent_dims=3, eps=1e-4, block_b=1024):
    """x: (B, in_dims) f32. ksi: (B, latent_pad) f32 standard-normal noise.
    params: zero-padded (in,out)-layout weights (bf16 or f32) + f32 (1,out) biases,
    with the mu/sigma heads fused as `wms`/`bms`."""
    B, in_dims = x.shape
    out_dims = params["w5"].shape[1]
    hp = params["w1"].shape[1]
    lp = params["wms"].shape[1] // 2
    assert ksi.shape == (B, lp), (ksi.shape, (B, lp))

    bb = _choose_block_b(B, block_b, _num_tensorcores())
    B_pad = pl.cdiv(B, bb) * bb
    if B_pad != B:
        x = jnp.pad(x, ((0, B_pad - B), (0, 0)))
        ksi = jnp.pad(ksi, ((0, B_pad - B), (0, 0)))

    weight_keys = ["w1", "b1", "w2", "b2", "wms", "bms",
                   "w3", "b3", "w4", "b4", "w5", "b5"]
    weight_args = [params[k] for k in weight_keys]

    in_specs = [pl.BlockSpec((bb, in_dims), lambda i: (i, 0)),
                pl.BlockSpec((bb, lp), lambda i: (i, 0))]
    in_specs += [_full_spec(params[k].shape) for k in weight_keys]
    out_specs = [pl.BlockSpec((bb, out_dims), lambda i: (i, 0)),
                 pl.BlockSpec((bb, 2 * lp), lambda i: (i, 0))]
    out_shape = (jax.ShapeDtypeStruct((B_pad, out_dims), jnp.float32),
                 jax.ShapeDtypeStruct((B_pad, 2 * lp), jnp.float32))

    # Advisory cost estimate for XLA's scheduler.
    flops = 2 * B_pad * (in_dims * hp + hp * hp + hp * (2 * lp)
                         + lp * hp + hp * hp + hp * out_dims)
    transcendentals = B_pad * (out_dims + 3 * lp)
    weight_bytes = sum(int(w.size) * jnp.dtype(w.dtype).itemsize for w in weight_args)
    bytes_accessed = 4 * B_pad * (in_dims + lp + out_dims + 2 * lp) + int(weight_bytes)

    recon, musig = pl.pallas_call(
        functools.partial(_vae_kernel, eps=eps, latent_pad=lp),
        out_shape=out_shape,
        grid_spec=pltpu.PrefetchScalarGridSpec(
            num_scalar_prefetch=0,
            grid=(B_pad // bb,),
            in_specs=in_specs,
            out_specs=out_specs,
        ),
        compiler_params=pltpu.CompilerParams(
            dimension_semantics=("parallel",),
        ),
        cost_estimate=pl.CostEstimate(
            flops=int(flops),
            transcendentals=int(transcendentals),
            bytes_accessed=int(bytes_accessed),
        ),
    )(x, ksi, *weight_args)

    mu = musig[:B, :latent_dims]
    sigma = musig[:B, lp:lp + latent_dims]
    return recon[:B], mu, sigma


def init_vae_params(key, in_dims=128, out_dims=128, latent_dims=3, hidden=100):
    """Torch-like nn.Linear init (U(-1/sqrt(fan_in), +)) at TRUE (unpadded) sizes."""
    def linear(key, fan_in, fan_out):
        kw, kb = jax.random.split(key)
        bound = 1.0 / float(fan_in) ** 0.5
        w = jax.random.uniform(kw, (fan_in, fan_out), jnp.float32, -bound, bound)
        b = jax.random.uniform(kb, (1, fan_out), jnp.float32, -bound, bound)
        return w, b

    keys = jax.random.split(key, 7)
    w1, b1 = linear(keys[0], in_dims, hidden)
    w2, b2 = linear(keys[1], hidden, hidden)
    wm, bm = linear(keys[2], hidden, latent_dims)
    ws, bs = linear(keys[3], hidden, latent_dims)
    w3, b3 = linear(keys[4], latent_dims, hidden)
    w4, b4 = linear(keys[5], hidden, hidden)
    w5, b5 = linear(keys[6], hidden, out_dims)
    return dict(w1=w1, b1=b1, w2=w2, b2=b2, wm=wm, bm=bm, ws=ws, bs=bs,
                w3=w3, b3=b3, w4=w4, b4=b4, w5=w5, b5=b5)


def pad_vae_params(p, hidden_pad=_HIDDEN_PAD, latent_pad=_LATENT_PAD,
                   matmul_dtype=jnp.bfloat16):
    """Zero-pad hidden/latent dims to lane/sublane-aligned sizes (numerically
    exact), fuse the mu/sigma heads, and cast MXU weights to `matmul_dtype`
    (biases stay f32 so all elementwise work is f32)."""
    def pad2(a, rows, cols):
        return jnp.pad(a, ((0, rows - a.shape[0]), (0, cols - a.shape[1])))

    in_dims = p["w1"].shape[0]
    out_dims = p["w5"].shape[1]
    wms = jnp.concatenate([pad2(p["wm"], hidden_pad, latent_pad),
                           pad2(p["ws"], hidden_pad, latent_pad)], axis=1)
    bms = jnp.concatenate([pad2(p["bm"], 1, latent_pad),
                           pad2(p["bs"], 1, latent_pad)], axis=1)
    return dict(
        w1=pad2(p["w1"], in_dims, hidden_pad).astype(matmul_dtype),
        b1=pad2(p["b1"], 1, hidden_pad),
        w2=pad2(p["w2"], hidden_pad, hidden_pad).astype(matmul_dtype),
        b2=pad2(p["b2"], 1, hidden_pad),
        wms=wms.astype(matmul_dtype),
        bms=bms,
        w3=pad2(p["w3"], latent_pad, hidden_pad).astype(matmul_dtype),
        b3=pad2(p["b3"], 1, hidden_pad),
        w4=pad2(p["w4"], hidden_pad, hidden_pad).astype(matmul_dtype),
        b4=pad2(p["b4"], 1, hidden_pad),
        w5=pad2(p["w5"], hidden_pad, out_dims).astype(matmul_dtype),
        b5=pad2(p["b5"], 1, out_dims),
    )


def vae_reference(x, ksi, p, eps=1e-4):
    """Pure-JAX f32 reference (unpadded params) mirroring the PyTorch forward."""
    h = jax.nn.relu(x @ p["w1"] + p["b1"])
    h = jax.nn.relu(h @ p["w2"] + p["b2"])
    mu = h @ p["wm"] + p["bm"]
    sigma = _softplus(h @ p["ws"] + p["bs"]) + eps
    std = jnp.exp(0.5 * sigma)
    z = ksi * std + mu
    d = jax.nn.relu(z @ p["w3"] + p["b3"])
    d = jax.nn.relu(d @ p["w4"] + p["b4"])
    recon = jnp.tanh(d @ p["w5"] + p["b5"])
    return recon, mu, sigma


if __name__ == "__main__":
    key = jax.random.PRNGKey(0)
    k_params, k_x, k_noise = jax.random.split(key, 3)

    IN_DIMS, OUT_DIMS, LATENT, HIDDEN, EPS = 128, 128, 3, 100, 1e-4
    BATCH = 256   # small demo batch

    raw_params = init_vae_params(k_params, IN_DIMS, OUT_DIMS, LATENT, HIDDEN)

    x = jax.random.normal(k_x, (BATCH, IN_DIMS), jnp.float32)
    ksi = jax.random.normal(k_noise, (BATCH, _LATENT_PAD), jnp.float32)

    ref_recon, ref_mu, ref_sigma = vae_reference(x, ksi[:, :LATENT], raw_params, eps=EPS)

    # --- fast path: bf16 MXU operands, f32 accumulation (loose tolerance) ---
    p_bf16 = pad_vae_params(raw_params, matmul_dtype=jnp.bfloat16)
    recon, mu, sigma = vae_forward(x, ksi, p_bf16, latent_dims=LATENT, eps=EPS)
    recon, mu, sigma = jax.block_until_ready((recon, mu, sigma))

    assert recon.shape == (BATCH, OUT_DIMS), recon.shape
    assert mu.shape == (BATCH, LATENT) and sigma.shape == (BATCH, LATENT)
    assert jnp.allclose(recon, ref_recon, atol=5e-2, rtol=5e-2), \
        float(jnp.max(jnp.abs(recon - ref_recon)))
    assert jnp.allclose(mu, ref_mu, atol=5e-2, rtol=5e-2), \
        float(jnp.max(jnp.abs(mu - ref_mu)))
    assert jnp.allclose(sigma, ref_sigma, atol=5e-2, rtol=5e-2), \
        float(jnp.max(jnp.abs(sigma - ref_sigma)))

    # --- exact path: f32 MXU operands for a strict numerical check ---
    p_f32 = pad_vae_params(raw_params, matmul_dtype=jnp.float32)
    recon32, mu32, sigma32 = vae_forward(x, ksi, p_f32, latent_dims=LATENT, eps=EPS)
    recon32, mu32, sigma32 = jax.block_until_ready((recon32, mu32, sigma32))

    assert jnp.allclose(recon32, ref_recon, atol=1e-4, rtol=1e-4), \
        float(jnp.max(jnp.abs(recon32 - ref_recon)))
    assert jnp.allclose(mu32, ref_mu, atol=1e-4, rtol=1e-4), \
        float(jnp.max(jnp.abs(mu32 - ref_mu)))
    assert jnp.allclose(sigma32, ref_sigma, atol=1e-4, rtol=1e-4), \
        float(jnp.max(jnp.abs(sigma32 - ref_sigma)))

    print("KERNEL_OK")
</pallas_src>

<mosaic_0001>
module attributes {stable_mosaic.version = 11 : i64} {
  func.func @_vae_kernel(%arg0: i32, %arg1: memref<256x128xf32, #tpu.memory_space<vmem>>, %arg2: memref<256x8xf32, #tpu.memory_space<vmem>>, %arg3: memref<128x128xbf16, #tpu.memory_space<vmem>>, %arg4: memref<1x128xf32, #tpu.memory_space<vmem>>, %arg5: memref<128x128xbf16, #tpu.memory_space<vmem>>, %arg6: memref<1x128xf32, #tpu.memory_space<vmem>>, %arg7: memref<128x16xbf16, #tpu.memory_space<vmem>>, %arg8: memref<1x16xf32, #tpu.memory_space<vmem>>, %arg9: memref<8x128xbf16, #tpu.memory_space<vmem>>, %arg10: memref<1x128xf32, #tpu.memory_space<vmem>>, %arg11: memref<128x128xbf16, #tpu.memory_space<vmem>>, %arg12: memref<1x128xf32, #tpu.memory_space<vmem>>, %arg13: memref<128x128xbf16, #tpu.memory_space<vmem>>, %arg14: memref<1x128xf32, #tpu.memory_space<vmem>>, %arg15: memref<256x128xf32, #tpu.memory_space<vmem>>, %arg16: memref<256x16xf32, #tpu.memory_space<vmem>>) attributes {dimension_semantics = [#tpu.dimension_semantics<parallel>], iteration_bounds = array<i64: 1>, scalar_prefetch = 0 : i64, scratch_operands = 0 : i64, tpu.core_type = #tpu.core_type<tc>, window_params = [{transform_indices = @transform_0, window_bounds = array<i64: 256, 128>}, {transform_indices = @transform_1, window_bounds = array<i64: 256, 8>}, {pipeline_mode = #tpu.pipeline_mode<synchronous>, transform_indices = @transform_2, window_bounds = array<i64: 128, 128>}, {pipeline_mode = #tpu.pipeline_mode<synchronous>, transform_indices = @transform_3, window_bounds = array<i64: 1, 128>}, {pipeline_mode = #tpu.pipeline_mode<synchronous>, transform_indices = @transform_4, window_bounds = array<i64: 128, 128>}, {pipeline_mode = #tpu.pipeline_mode<synchronous>, transform_indices = @transform_5, window_bounds = array<i64: 1, 128>}, {pipeline_mode = #tpu.pipeline_mode<synchronous>, transform_indices = @transform_6, window_bounds = array<i64: 128, 16>}, {pipeline_mode = #tpu.pipeline_mode<synchronous>, transform_indices = @transform_7, window_bounds = array<i64: 1, 16>}, {pipeline_mode = #tpu.pipeline_mode<synchronous>, transform_indices = @transform_8, window_bounds = array<i64: 8, 128>}, {pipeline_mode = #tpu.pipeline_mode<synchronous>, transform_indices = @transform_9, window_bounds = array<i64: 1, 128>}, {pipeline_mode = #tpu.pipeline_mode<synchronous>, transform_indices = @transform_10, window_bounds = array<i64: 128, 128>}, {pipeline_mode = #tpu.pipeline_mode<synchronous>, transform_indices = @transform_11, window_bounds = array<i64: 1, 128>}, {pipeline_mode = #tpu.pipeline_mode<synchronous>, transform_indices = @transform_12, window_bounds = array<i64: 128, 128>}, {pipeline_mode = #tpu.pipeline_mode<synchronous>, transform_indices = @transform_13, window_bounds = array<i64: 1, 128>}, {transform_indices = @transform_14, window_bounds = array<i64: 256, 128>}, {transform_indices = @transform_15, window_bounds = array<i64: 256, 16>}]} {
    %c0 = arith.constant 0 : index
    %c0_0 = arith.constant 0 : index
    %0 = vector.load %arg1[%c0, %c0_0] : memref<256x128xf32, #tpu.memory_space<vmem>>, vector<256x128xf32>
    %1 = arith.truncf %0 : vector<256x128xf32> to vector<256x128xbf16>
    %c0_1 = arith.constant 0 : index
    %c0_2 = arith.constant 0 : index
    %2 = vector.load %arg3[%c0_1, %c0_2] : memref<128x128xbf16, #tpu.memory_space<vmem>>, vector<128x128xbf16>
    %cst = arith.constant dense<0.000000e+00> : vector<256x128xf32>
    %3 = tpu.matmul %1, %2, %cst {dimension_numbers = #tpu.dot_dimension_numbers<[1], [0], [0], [1], [0, 0, 1, 1], [], []>} : vector<256x128xbf16>, vector<128x128xbf16>, vector<256x128xf32> -> vector<256x128xf32>
    %c0_3 = arith.constant 0 : index
    %c0_4 = arith.constant 0 : index
    %4 = vector.load %arg4[%c0_3, %c0_4] : memref<1x128xf32, #tpu.memory_space<vmem>>, vector<1x128xf32>
    %5 = vector.broadcast %4 : vector<1x128xf32> to vector<256x128xf32>
    %6 = arith.addf %3, %5 : vector<256x128xf32>
    %cst_5 = arith.constant 0.000000e+00 : f32
    %7 = vector.broadcast %cst_5 : f32 to vector<256x128xf32>
    %8 = arith.maximumf %6, %7 : vector<256x128xf32>
    %9 = arith.truncf %8 : vector<256x128xf32> to vector<256x128xbf16>
    %c0_6 = arith.constant 0 : index
    %c0_7 = arith.constant 0 : index
    %10 = vector.load %arg5[%c0_6, %c0_7] : memref<128x128xbf16, #tpu.memory_space<vmem>>, vector<128x128xbf16>
    %cst_8 = arith.constant dense<0.000000e+00> : vector<256x128xf32>
    %11 = tpu.matmul %9, %10, %cst_8 {dimension_numbers = #tpu.dot_dimension_numbers<[1], [0], [0], [1], [0, 0, 1, 1], [], []>} : vector<256x128xbf16>, vector<128x128xbf16>, vector<256x128xf32> -> vector<256x128xf32>
    %c0_9 = arith.constant 0 : index
    %c0_10 = arith.constant 0 : index
    %12 = vector.load %arg6[%c0_9, %c0_10] : memref<1x128xf32, #tpu.memory_space<vmem>>, vector<1x128xf32>
    %13 = vector.broadcast %12 : vector<1x128xf32> to vector<256x128xf32>
    %14 = arith.addf %11, %13 : vector<256x128xf32>
    %cst_11 = arith.constant 0.000000e+00 : f32
    %15 = vector.broadcast %cst_11 : f32 to vector<256x128xf32>
    %16 = arith.maximumf %14, %15 : vector<256x128xf32>
    %17 = arith.truncf %16 : vector<256x128xf32> to vector<256x128xbf16>
    %c0_12 = arith.constant 0 : index
    %c0_13 = arith.constant 0 : index
    %18 = vector.load %arg7[%c0_12, %c0_13] : memref<128x16xbf16, #tpu.memory_space<vmem>>, vector<128x16xbf16>
    %cst_14 = arith.constant dense<0.000000e+00> : vector<256x16xf32>
    %19 = tpu.matmul %17, %18, %cst_14 {dimension_numbers = #tpu.dot_dimension_numbers<[1], [0], [0], [1], [0, 0, 1, 1], [], []>} : vector<256x128xbf16>, vector<128x16xbf16>, vector<256x16xf32> -> vector<256x16xf32>
    %c0_15 = arith.constant 0 : index
    %c0_16 = arith.constant 0 : index
    %20 = vector.load %arg8[%c0_15, %c0_16] : memref<1x16xf32, #tpu.memory_space<vmem>>, vector<1x16xf32>
    %21 = vector.broadcast %20 : vector<1x16xf32> to vector<256x16xf32>
    %22 = arith.addf %19, %21 : vector<256x16xf32>
    %23 = vector.extract_strided_slice %22 {offsets = [0, 0], sizes = [256, 8], strides = [1, 1]} : vector<256x16xf32> to vector<256x8xf32>
    %24 = vector.extract_strided_slice %22 {offsets = [0, 8], sizes = [256, 8], strides = [1, 1]} : vector<256x16xf32> to vector<256x8xf32>
    %cst_17 = arith.constant 0.000000e+00 : f32
    %25 = vector.broadcast %cst_17 : f32 to vector<256x8xf32>
    %26 = arith.maximumf %24, %25 : vector<256x8xf32>
    %27 = math.absf %24 : vector<256x8xf32>
    %cst_18 = arith.constant 0.000000e+00 : f32
    %28 = vector.broadcast %cst_18 : f32 to vector<256x8xf32>
    %29 = arith.subf %28, %27 : vector<256x8xf32>
    %30 = math.exp %29 : vector<256x8xf32>
    %cst_19 = arith.constant 1.000000e+00 : f32
    %31 = vector.broadcast %cst_19 : f32 to vector<256x8xf32>
    %32 = arith.addf %31, %30 : vector<256x8xf32>
    %33 = math.log %32 : vector<256x8xf32>
    %34 = arith.addf %26, %33 : vector<256x8xf32>
    %cst_20 = arith.constant 9.99999974E-5 : f32
    %35 = vector.broadcast %cst_20 : f32 to vector<256x8xf32>
    %36 = arith.addf %34, %35 : vector<256x8xf32>
    %cst_21 = arith.constant 5.000000e-01 : f32
    %37 = vector.broadcast %cst_21 : f32 to vector<256x8xf32>
    %38 = arith.mulf %37, %36 : vector<256x8xf32>
    %39 = math.exp %38 : vector<256x8xf32>
    %c0_22 = arith.constant 0 : index
    %c0_23 = arith.constant 0 : index
    %40 = vector.load %arg2[%c0_22, %c0_23] : memref<256x8xf32, #tpu.memory_space<vmem>>, vector<256x8xf32>
    %41 = arith.mulf %40, %39 : vector<256x8xf32>
    %42 = arith.addf %41, %23 : vector<256x8xf32>
    %43 = arith.truncf %42 : vector<256x8xf32> to vector<256x8xbf16>
    %c0_24 = arith.constant 0 : index
    %c0_25 = arith.constant 0 : index
    %44 = vector.load %arg9[%c0_24, %c0_25] : memref<8x128xbf16, #tpu.memory_space<vmem>>, vector<8x128xbf16>
    %cst_26 = arith.constant dense<0.000000e+00> : vector<256x128xf32>
    %45 = tpu.matmul %43, %44, %cst_26 {dimension_numbers = #tpu.dot_dimension_numbers<[1], [0], [0], [1], [0, 0, 1, 1], [], []>} : vector<256x8xbf16>, vector<8x128xbf16>, vector<256x128xf32> -> vector<256x128xf32>
    %c0_27 = arith.constant 0 : index
    %c0_28 = arith.constant 0 : index
    %46 = vector.load %arg10[%c0_27, %c0_28] : memref<1x128xf32, #tpu.memory_space<vmem>>, vector<1x128xf32>
    %47 = vector.broadcast %46 : vector<1x128xf32> to vector<256x128xf32>
    %48 = arith.addf %45, %47 : vector<256x128xf32>
    %cst_29 = arith.constant 0.000000e+00 : f32
    %49 = vector.broadcast %cst_29 : f32 to vector<256x128xf32>
    %50 = arith.maximumf %48, %49 : vector<256x128xf32>
    %51 = arith.truncf %50 : vector<256x128xf32> to vector<256x128xbf16>
    %c0_30 = arith.constant 0 : index
    %c0_31 = arith.constant 0 : index
    %52 = vector.load %arg11[%c0_30, %c0_31] : memref<128x128xbf16, #tpu.memory_space<vmem>>, vector<128x128xbf16>
    %cst_32 = arith.constant dense<0.000000e+00> : vector<256x128xf32>
    %53 = tpu.matmul %51, %52, %cst_32 {dimension_numbers = #tpu.dot_dimension_numbers<[1], [0], [0], [1], [0, 0, 1, 1], [], []>} : vector<256x128xbf16>, vector<128x128xbf16>, vector<256x128xf32> -> vector<256x128xf32>
    %c0_33 = arith.constant 0 : index
    %c0_34 = arith.constant 0 : index
    %54 = vector.load %arg12[%c0_33, %c0_34] : memref<1x128xf32, #tpu.memory_space<vmem>>, vector<1x128xf32>
    %55 = vector.broadcast %54 : vector<1x128xf32> to vector<256x128xf32>
    %56 = arith.addf %53, %55 : vector<256x128xf32>
    %cst_35 = arith.constant 0.000000e+00 : f32
    %57 = vector.broadcast %cst_35 : f32 to vector<256x128xf32>
    %58 = arith.maximumf %56, %57 : vector<256x128xf32>
    %59 = arith.truncf %58 : vector<256x128xf32> to vector<256x128xbf16>
    %c0_36 = arith.constant 0 : index
    %c0_37 = arith.constant 0 : index
    %60 = vector.load %arg13[%c0_36, %c0_37] : memref<128x128xbf16, #tpu.memory_space<vmem>>, vector<128x128xbf16>
    %cst_38 = arith.constant dense<0.000000e+00> : vector<256x128xf32>
    %61 = tpu.matmul %59, %60, %cst_38 {dimension_numbers = #tpu.dot_dimension_numbers<[1], [0], [0], [1], [0, 0, 1, 1], [], []>} : vector<256x128xbf16>, vector<128x128xbf16>, vector<256x128xf32> -> vector<256x128xf32>
    %c0_39 = arith.constant 0 : index
    %c0_40 = arith.constant 0 : index
    %62 = vector.load %arg14[%c0_39, %c0_40] : memref<1x128xf32, #tpu.memory_space<vmem>>, vector<1x128xf32>
    %63 = vector.broadcast %62 : vector<1x128xf32> to vector<256x128xf32>
    %64 = arith.addf %61, %63 : vector<256x128xf32>
    %65 = math.tanh %64 : vector<256x128xf32>
    %c0_41 = arith.constant 0 : index
    %c0_42 = arith.constant 0 : index
    %66 = vector.load %arg15[%c0_41, %c0_42] : memref<256x128xf32, #tpu.memory_space<vmem>>, vector<256x128xf32>
    tpu.vector_store %arg15[%c0_41, %c0_42], %65 {strides = array<i32>} : memref<256x128xf32, #tpu.memory_space<vmem>>, vector<256x128xf32>,
    %67 = tpu.concatenate %23, %36 in 1 : vector<256x8xf32>, vector<256x8xf32> -> vector<256x16xf32>
    %c0_43 = arith.constant 0 : index
    %c0_44 = arith.constant 0 : index
    %68 = vector.load %arg16[%c0_43, %c0_44] : memref<256x16xf32, #tpu.memory_space<vmem>>, vector<256x16xf32>
    tpu.vector_store %arg16[%c0_43, %c0_44], %67 {strides = array<i32>} : memref<256x16xf32, #tpu.memory_space<vmem>>, vector<256x16xf32>,
    return
  }
  func.func @transform_0(%arg0: i32) -> (i32, i32) {
    %c0_i32 = arith.constant 0 : i32
    %c0_i32_0 = arith.constant 0 : i32
    return %arg0, %c0_i32 : i32, i32
  }
  func.func @transform_1(%arg0: i32) -> (i32, i32) {
    %c0_i32 = arith.constant 0 : i32
    %c0_i32_0 = arith.constant 0 : i32
    return %arg0, %c0_i32 : i32, i32
  }
  func.func @transform_2(%arg0: i32) -> (i32, i32) {
    %c0_i32 = arith.constant 0 : i32
    %c0_i32_0 = arith.constant 0 : i32
    %c0_i32_1 = arith.constant 0 : i32
    return %c0_i32, %c0_i32_0 : i32, i32
  }
  func.func @transform_3(%arg0: i32) -> (i32, i32) {
    %c0_i32 = arith.constant 0 : i32
    %c0_i32_0 = arith.constant 0 : i32
    %c0_i32_1 = arith.constant 0 : i32
    return %c0_i32, %c0_i32_0 : i32, i32
  }
  func.func @transform_4(%arg0: i32) -> (i32, i32) {
    %c0_i32 = arith.constant 0 : i32
    %c0_i32_0 = arith.constant 0 : i32
    %c0_i32_1 = arith.constant 0 : i32
    return %c0_i32, %c0_i32_0 : i32, i32
  }
  func.func @transform_5(%arg0: i32) -> (i32, i32) {
    %c0_i32 = arith.constant 0 : i32
    %c0_i32_0 = arith.constant 0 : i32
    %c0_i32_1 = arith.constant 0 : i32
    return %c0_i32, %c0_i32_0 : i32, i32
  }
  func.func @transform_6(%arg0: i32) -> (i32, i32) {
    %c0_i32 = arith.constant 0 : i32
    %c0_i32_0 = arith.constant 0 : i32
    %c0_i32_1 = arith.constant 0 : i32
    return %c0_i32, %c0_i32_0 : i32, i32
  }
  func.func @transform_7(%arg0: i32) -> (i32, i32) {
    %c0_i32 = arith.constant 0 : i32
    %c0_i32_0 = arith.constant 0 : i32
    %c0_i32_1 = arith.constant 0 : i32
    return %c0_i32, %c0_i32_0 : i32, i32
  }
  func.func @transform_8(%arg0: i32) -> (i32, i32) {
    %c0_i32 = arith.constant 0 : i32
    %c0_i32_0 = arith.constant 0 : i32
    %c0_i32_1 = arith.constant 0 : i32
    return %c0_i32, %c0_i32_0 : i32, i32
  }
  func.func @transform_9(%arg0: i32) -> (i32, i32) {
    %c0_i32 = arith.constant 0 : i32
    %c0_i32_0 = arith.constant 0 : i32
    %c0_i32_1 = arith.constant 0 : i32
    return %c0_i32, %c0_i32_0 : i32, i32
  }
  func.func @transform_10(%arg0: i32) -> (i32, i32) {
    %c0_i32 = arith.constant 0 : i32
    %c0_i32_0 = arith.constant 0 : i32
    %c0_i32_1 = arith.constant 0 : i32
    return %c0_i32, %c0_i32_0 : i32, i32
  }
  func.func @transform_11(%arg0: i32) -> (i32, i32) {
    %c0_i32 = arith.constant 0 : i32
    %c0_i32_0 = arith.constant 0 : i32
    %c0_i32_1 = arith.constant 0 : i32
    return %c0_i32, %c0_i32_0 : i32, i32
  }
  func.func @transform_12(%arg0: i32) -> (i32, i32) {
    %c0_i32 = arith.constant 0 : i32
    %c0_i32_0 = arith.constant 0 : i32
    %c0_i32_1 = arith.constant 0 : i32
    return %c0_i32, %c0_i32_0 : i32, i32
  }
  func.func @transform_13(%arg0: i32) -> (i32, i32) {
    %c0_i32 = arith.constant 0 : i32
    %c0_i32_0 = arith.constant 0 : i32
    %c0_i32_1 = arith.constant 0 : i32
    return %c0_i32, %c0_i32_0 : i32, i32
  }
  func.func @transform_14(%arg0: i32) -> (i32, i32) {
    %c0_i32 = arith.constant 0 : i32
    %c0_i32_0 = arith.constant 0 : i32
    return %arg0, %c0_i32 : i32, i32
  }
  func.func @transform_15(%arg0: i32) -> (i32, i32) {
    %c0_i32 = arith.constant 0 : i32
    %c0_i32_0 = arith.constant 0 : i32
    return %arg0, %c0_i32 : i32, i32
  }
}

</mosaic_0001>

<bundles_post_ra>
// kernel: vae_forward.1
= control target key start
LH: loop header
LB: loop body
LE: loop exit
PB: predicated region body
PF: predicated region fallthrough
CT: control target
= control target key end

     0   :  { %21 = vsyncpa [#allocation3], 0  ;;  %s4482_s0 = inlined_call_operand.vmem [shape: f32[256,128], index: 0, kind: input, shape index: {}]   ;;  %s4483_s1 = inlined_call_operand.vmem [shape: f32[256,8], index: 1, kind: input, shape index: {}]   ;;  %s4484_s2 = inlined_call_operand.vmem [shape: bf16[128,128], index: 2, kind: input, shape index: {}]   ;;  %s4485_s3 = inlined_call_operand.vmem [shape: f32[1,128], index: 3, kind: input, shape index: {}]   ;;  %s4486_s4 = inlined_call_operand.hbm [shape: bf16[128,128], index: 4, kind: input, shape index: {}]   ;;  %s4487_s5 = inlined_call_operand.vmem [shape: f32[1,128], index: 5, kind: input, shape index: {}]   ;;  %s4488_s6 = inlined_call_operand.vmem [shape: bf16[128,16], index: 6, kind: input, shape index: {}]   ;;  %s4489_s7 = inlined_call_operand.vmem [shape: f32[1,16], index: 7, kind: input, shape index: {}]   ;;  %s4490_s8 = inlined_call_operand.vmem [shape: bf16[8,128], index: 8, kind: input, shape index: {}]   ;;  %s4491_s9 = inlined_call_operand.vmem [shape: f32[1,128], index: 9, kind: input, shape index: {}]   ;;  %s4492_s10 = inlined_call_operand.hbm [shape: bf16[128,128], index: 10, kind: input, shape index: {}]   ;;  %s4493_s11 = inlined_call_operand.vmem [shape: f32[1,128], index: 11, kind: input, shape index: {}]   ;;  %s4494_s12 = inlined_call_operand.hbm [shape: bf16[128,128], index: 12, kind: input, shape index: {}]   ;;  %s4495_s13 = inlined_call_operand.vmem [shape: f32[1,128], index: 13, kind: input, shape index: {}]   ;;  %s4496_s14 = inlined_call_operand.hbm [shape: f32[256,128], index: 14, kind: output, shape index: {0}]   ;;  %s4497_s15 = inlined_call_operand.vmem [shape: f32[256,16], index: 15, kind: output, shape index: {1}]  }
   0x1   :  { %22 = vsyncpa [#allocation6], 0 }
   0x2   :  { %23 = vsyncpa [#allocation4], 0  ;;  %s3386_s18 = smov [#allocation5]   ;;  %s3387_s20 = smov [#allocation2]  }
   0x3   :  { %s59_s19 = sshll.u32 %s3386_s18, 4  ;;  %s37_s21 = sshll.u32 %s3387_s20, 4  ;;  %s60_s19 = int_to_ptr.vmem [resolvable:$true] %s59_s19  ;;  %s38_s21 = int_to_ptr.vmem [resolvable:$true] %s37_s21 }
   0x4   :  { %s3308_s22 = scalar_lea.vmem %s60_s19, 1024  ;;  %p3313_p1 = scmp.lt.s32.totalorder %s60_s19, %s60_s19 }
   0x5   :  { %p3309_p0 = scmp.ne.s32.totalorder %s60_s19, %s3308_s22  ;;  %p3314_p2 = scmp.lt.s32.totalorder %s3308_s22, %s3308_s22 }
   0x7   :  { %p3315_p3 = por %p3314_p2, %p3313_p1 }
   0x9   :  { %p3316_p4 = pnand %p3315_p3, %p3309_p0 }
   0xb   :  { %3319 = shalt.err (!%p3316_p4)
}
   0xc   :  { %s3388_s23 = smov 64   ;;  %s3389_s24 = smov 4  }
   0xd   :  { %65 = dma.hbm_to_vmem [thread:$0]  %s4492_s10, 1024, %s60_s19, [#allocation6], %s3388_s23, %s3388_s23, %s3389_s24  }
   0xe   :  { %s3328_s27 = scalar_lea.vmem %s38_s21, 1024  ;;  %p3333_p6 = scmp.lt.s32.totalorder %s38_s21, %s38_s21 }
   0xf   :  { %p3329_p5 = scmp.ne.s32.totalorder %s38_s21, %s3328_s27  ;;  %p3334_p7 = scmp.lt.s32.totalorder %s3328_s27, %s3328_s27 }
  0x11   :  { %p3335_p8 = por %p3334_p7, %p3333_p6 }
  0x13   :  { %p3336_p9 = pnand %p3335_p8, %p3329_p5 }
  0x15   :  { %3339 = shalt.err (!%p3336_p9)
}
  0x16   :  { %43 = dma.hbm_to_vmem [thread:$0]  %s4486_s4, 1024, %s38_s21, [#allocation3], %s3388_s23, %s3388_s23, %s3389_s24  }
  0x17   :  { %s3390_s30 = smov [#allocation7]  }
  0x18   :  { %s73_s16 = sshll.u32 %s3390_s30, 4  ;;  %s74_s16 = int_to_ptr.vmem [resolvable:$true] %s73_s16 }
  0x19   :  { %s3348_s17 = scalar_lea.vmem %s74_s16, 1024  ;;  %p3353_p11 = scmp.lt.s32.totalorder %s74_s16, %s74_s16 }
  0x1a   :  { %p3349_p10 = scmp.ne.s32.totalorder %s74_s16, %s3348_s17  ;;  %p3354_p12 = scmp.lt.s32.totalorder %s3348_s17, %s3348_s17 }
  0x1c   :  { %p3355_p13 = por %p3354_p12, %p3353_p11 }
  0x1e   :  { %p3356_p0 = pnand %p3355_p13, %p3349_p10 }
  0x20   :  { %3359 = shalt.err (!%p3356_p0)
}
  0x21   :  { %79 = dma.hbm_to_vmem [thread:$0]  %s4494_s12, 1024, %s74_s16, [#allocation6], %s3388_s23, %s3388_s23, %s3389_s24  }
  0x22   :  { %3380 = dma.done.wait [#allocation3], 1024  }
  0x23   :  { %3381 = vsyncadd [#allocation3], 4294966272 }
  0x24   :  { %3382 = dma.done.wait [#allocation6], 2048  }
  0x25   :  { %3383 = vsyncadd [#allocation6], 4294965248  ;;  %v3004_v0 = vld [vmem:[%s4484_s2 + $0x38] sm:$0xff]   ;;  %v3005_v1 = vld [vmem:[%s4484_s2 + $0x30] sm:$0xff]   ;;  %vm1596_vm0 = vcmask 64512   ;;  %vm2466_vm1 = vcmask 130048  }
  0x26   :  { %2720 = vmatprep.subr.bf16.mxu0 %v3004_v0  ;;  %v3006_v2 = vld [vmem:[%s4484_s2 + $0x28] sm:$0xff]   ;;  %v3007_v3 = vld [vmem:[%s4484_s2 + $0x20] sm:$0xff]   ;;  %v3008_v7 = vld [vmem:[%s4484_s2 + $0x18] sm:$0xff]   ;;  %vm1645_vm2 = vcmask 1043456   ;;  %s3391_s21 = smov 120  }
  0x27   :  { %2721 = vmatpush3.bf16.msra.mxu0 %v3004_v0  ;;  %v92_v4 = vld [vmem:[%s4482_s0] sm:$0xff]  ;;  %v93_v5 = vld [vmem:[%s4482_s0 + $0x8] sm:$0xff]  ;;  %v3009_v8 = vld [vmem:[%s4484_s2 + $0x10] sm:$0xff]  }
  0x28   :  { %2722 = vmatprep.subr.bf16.mxu0 %v3005_v1  ;;  %v124_v6 = vpack.c.bf16 %v93_v5, %v92_v4  ;;  %v3010_v9 = vld [vmem:[%s4484_s2 + $0x8] sm:$0xff]   ;;  %v3012_v10 = vld [vmem:[#allocation2 + $0x38] sm:$0xff]   ;;  %v3013_v11 = vld [vmem:[#allocation2 + $0x30] sm:$0xff]  }
  0x29   :  { %2768 = vmatprep.subr.bf16.mxu1 %v3012_v10  ;;  %v3011_v12 = vld [vmem:[%s4484_s2] sm:$0xff]   ;;  %v3014_v13 = vld [vmem:[#allocation2 + $0x28] sm:$0xff]   ;;  %v94_v14 = vld [vmem:[%s4482_s0 + $0x10] sm:$0xff] }
  0x2a   :  { %2736 = vmatprep.mubr.bf16.mxu0 %v124_v6  ;;  %2769 = vmatpush3.bf16.msra.mxu1 %v3012_v10  ;;  %v95_v15 = vld [vmem:[%s4482_s0 + $0x18] sm:$0xff]  ;;  %v3015_v16 = vld [vmem:[#allocation2 + $0x20] sm:$0xff]   ;;  %v97_v18 = vld [vmem:[%s4482_s0 + $0x28] sm:$0xff] }
  0x2b   :  { %2723 = vmatpush3.bf16.msra.mxu0 %v3005_v1  ;;  %2770 = vmatprep.subr.bf16.mxu1 %v3013_v11  ;;  %v96_v17 = vld [vmem:[%s4482_s0 + $0x20] sm:$0xff]  ;;  %v3016_v19 = vld [vmem:[#allocation2 + $0x18] sm:$0xff]   ;;  %v125_v20 = vpack.c.bf16 %v95_v15, %v94_v14  ;;  %v98_v22 = vld [vmem:[%s4482_s0 + $0x30] sm:$0xff] }
  0x2c   :  { %2724 = vmatprep.subr.bf16.mxu0 %v3006_v2  ;;  %v126_v21 = vpack.c.bf16 %v97_v18, %v96_v17  ;;  %v99_v23 = vld [vmem:[%s4482_s0 + $0x38] sm:$0xff]  ;;  %v100_v24 = vld [vmem:[%s4482_s0 + $0x40] sm:$0xff]  ;;  %v101_v25 = vld [vmem:[%s4482_s0 + $0x48] sm:$0xff] }
  0x2d   :  { %v127_v26 = vpack.c.bf16 %v99_v23, %v98_v22  ;;  %v128_v27 = vpack.c.bf16 %v101_v25, %v100_v24  ;;  %v102_v28 = vld [vmem:[%s4482_s0 + $0x50] sm:$0xff]  ;;  %v103_v29 = vld [vmem:[%s4482_s0 + $0x58] sm:$0xff]  ;;  %v104_v30 = vld [vmem:[%s4482_s0 + $0x60] sm:$0xff] }
  0x2e   :  { %2771 = vmatpush3.bf16.msra.mxu1 %v3013_v11  ;;  %v105_v31 = vld [vmem:[%s4482_s0 + $0x68] sm:$0xff]  ;;  %v129_v32 = vpack.c.bf16 %v103_v29, %v102_v28  ;;  %v106_v34 = vld [vmem:[%s4482_s0 + $0x70] sm:$0xff]  ;;  %v107_v35 = vld [vmem:[%s4482_s0 + $0x78] sm:$0xff] }
  0x2f   :  { %2725 = vmatpush3.bf16.msra.mxu0 %v3006_v2  ;;  %2772 = vmatprep.subr.bf16.mxu1 %v3014_v13  ;;  %v130_v33 = vpack.c.bf16 %v105_v31, %v104_v30  ;;  %v108_v36 = vld [vmem:[%s4482_s0 + $0x80] sm:$0xff]  ;;  %v109_v37 = vld [vmem:[%s4482_s0 + $0x88] sm:$0xff]  ;;  %v131_v38 = vpack.c.bf16 %v107_v35, %v106_v34  ;;  %v110_v40 = vld [vmem:[%s4482_s0 + $0x90] sm:$0xff] }
  0x30   :  { %2726 = vmatprep.subr.bf16.mxu0 %v3007_v3  ;;  %v132_v39 = vpack.c.bf16 %v109_v37, %v108_v36  ;;  %v111_v41 = vld [vmem:[%s4482_s0 + $0x98] sm:$0xff]  ;;  %v112_v42 = vld [vmem:[%s4482_s0 + $0xa0] sm:$0xff]  ;;  %v113_v43 = vld [vmem:[%s4482_s0 + $0xa8] sm:$0xff] }
  0x31   :  { %v133_v44 = vpack.c.bf16 %v111_v41, %v110_v40  ;;  %v134_v45 = vpack.c.bf16 %v113_v43, %v112_v42  ;;  %v114_v46 = vld [vmem:[%s4482_s0 + $0xb0] sm:$0xff]  ;;  %v115_v47 = vld [vmem:[%s4482_s0 + $0xb8] sm:$0xff]  ;;  %v116_v48 = vld [vmem:[%s4482_s0 + $0xc0] sm:$0xff] }
  0x32   :  { %2773 = vmatpush3.bf16.msra.mxu1 %v3014_v13  ;;  %v117_v49 = vld [vmem:[%s4482_s0 + $0xc8] sm:$0xff]  ;;  %v135_v50 = vpack.c.bf16 %v115_v47, %v114_v46  ;;  %v118_v52 = vld [vmem:[%s4482_s0 + $0xd0] sm:$0xff]  ;;  %v119_v53 = vld [vmem:[%s4482_s0 + $0xd8] sm:$0xff] }
  0x33   :  { %2727 = vmatpush3.bf16.msra.mxu0 %v3007_v3  ;;  %2774 = vmatprep.subr.bf16.mxu1 %v3015_v16  ;;  %v136_v51 = vpack.c.bf16 %v117_v49, %v116_v48  ;;  %v120_v54 = vld [vmem:[%s4482_s0 + $0xe0] sm:$0xff]  ;;  %v121_v55 = vld [vmem:[%s4482_s0 + $0xe8] sm:$0xff]  ;;  %v137_v56 = vpack.c.bf16 %v119_v53, %v118_v52  ;;  %v122_v58 = vld [vmem:[%s4482_s0 + $0xf0] sm:$0xff] }
  0x34   :  { %2728 = vmatprep.subr.bf16.mxu0 %v3008_v7  ;;  %v138_v57 = vpack.c.bf16 %v121_v55, %v120_v54  ;;  %v123_v59 = vld [vmem:[%s4482_s0 + $0xf8] sm:$0xff]  ;;  %v3017_v61 = vld [vmem:[#allocation2 + $0x10] sm:$0xff]   ;;  %v3018_v62 = vld [vmem:[#allocation2 + $0x8] sm:$0xff]  }
  0x35   :  { %v139_v60 = vpack.c.bf16 %v123_v59, %v122_v58  ;;  %v3019_v63 = vld [vmem:[#allocation2] sm:$0xff]   ;;  %v3020_v0 = vld [vmem:[%s4488_s6 + $0x38] sm:$0xff]   ;;  %v3021_v1 = vld [vmem:[%s4488_s6 + $0x30] sm:$0xff]  }
  0x36   :  { %2775 = vmatpush3.bf16.msra.mxu1 %v3015_v16  ;;  %v3022_v2 = vld [vmem:[%s4488_s6 + $0x28] sm:$0xff]   ;;  %v3023_v3 = vld [vmem:[%s4488_s6 + $0x20] sm:$0xff]   ;;  %v3024_v4 = vld [vmem:[%s4488_s6 + $0x18] sm:$0xff]  }
  0x37   :  { %2729 = vmatpush3.bf16.msra.mxu0 %v3008_v7  ;;  %2776 = vmatprep.subr.bf16.mxu1 %v3016_v19  ;;  %v3025_v5 = vld [vmem:[%s4488_s6 + $0x10] sm:$0xff]   ;;  %v3026_v6 = vld [vmem:[%s4488_s6 + $0x8] sm:$0xff]  }
  0x38   :  { %2730 = vmatprep.subr.bf16.mxu0 %v3009_v8 }
  0x3a   :  { %2777 = vmatpush3.bf16.msra.mxu1 %v3016_v19 }
  0x3b   :  { %2731 = vmatpush3.bf16.msra.mxu0 %v3009_v8  ;;  %2778 = vmatprep.subr.bf16.mxu1 %v3017_v61 }
  0x3c   :  { %2732 = vmatprep.subr.bf16.mxu0 %v3010_v9 }
  0x3e   :  { %2779 = vmatpush3.bf16.msra.mxu1 %v3017_v61 }
  0x3f   :  { %2733 = vmatpush3.bf16.msra.mxu0 %v3010_v9  ;;  %2780 = vmatprep.subr.bf16.mxu1 %v3018_v62  ;;  %v3628_v9 = vld [vmem:[%s4485_s3] ss:$0 sm:$0xff] }
  0x40   :  { %2734 = vmatprep.subr.bf16.mxu0 %v3011_v12 }
  0x42   :  { %2781 = vmatpush3.bf16.msra.mxu1 %v3018_v62 }
  0x43   :  { %2735 = vmatpush3.bf16.msra.mxu0 %v3011_v12  ;;  %2782 = vmatprep.subr.bf16.mxu1 %v3019_v63 }
  0x44   :  { %2816 = vmatprep.subr.bf16.mxu0 %v3020_v0 }
  0x46   :  { %2737 = vmatmul.mubr.bf16.vlgmr.msra.gmra.mxu0 %v125_v20  ;;  %2783 = vmatpush3.bf16.msra.mxu1 %v3019_v63 }
  0x47   :  { %2740 = vmatprep.mubr.bf16.mxu0 %v126_v21  ;;  %2817 = vmatpush3.bf16.msra.mxu0 %v3020_v0 }
  0x48   :  { %2818 = vmatprep.subr.bf16.mxu0 %v3021_v1 }
  0x4b   :  { %2819 = vmatpush3.bf16.msra.mxu0 %v3021_v1 }
  0x4c   :  { %2820 = vmatprep.subr.bf16.mxu0 %v3022_v2 }
  0x4e   :  { %2741 = vmatmul.mubr.bf16.gmra.mxu0 %v127_v26 }
  0x4f   :  { %2744 = vmatprep.mubr.bf16.mxu0 %v128_v27  ;;  %2821 = vmatpush3.bf16.msra.mxu0 %v3022_v2 }
  0x50   :  { %2822 = vmatprep.subr.bf16.mxu0 %v3023_v3 }
  0x53   :  { %2823 = vmatpush3.bf16.msra.mxu0 %v3023_v3 }
  0x54   :  { %2824 = vmatprep.subr.bf16.mxu0 %v3024_v4 }
  0x56   :  { %2745 = vmatmul.mubr.bf16.gmra.mxu0 %v129_v32 }
  0x57   :  { %2748 = vmatprep.mubr.bf16.mxu0 %v130_v33  ;;  %2825 = vmatpush3.bf16.msra.mxu0 %v3024_v4 }
  0x58   :  { %2826 = vmatprep.subr.bf16.mxu0 %v3025_v5 }
  0x5b   :  { %2827 = vmatpush3.bf16.msra.mxu0 %v3025_v5 }
  0x5c   :  { %2828 = vmatprep.subr.bf16.mxu0 %v3026_v6 }
  0x5e   :  { %2749 = vmatmul.mubr.bf16.gmra.mxu0 %v131_v38 }
  0x5f   :  { %2752 = vmatprep.mubr.bf16.mxu0 %v132_v39  ;;  %2829 = vmatpush3.bf16.msra.mxu0 %v3026_v6 }
  0x66   :  { %2753 = vmatmul.mubr.bf16.gmra.mxu0 %v133_v44 }
  0x67   :  { %2756 = vmatprep.mubr.bf16.mxu0 %v134_v45 }
  0x6e   :  { %2757 = vmatmul.mubr.bf16.gmra.mxu0 %v135_v50 }
  0x6f   :  { %2760 = vmatprep.mubr.bf16.mxu0 %v136_v51 }
  0x76   :  { %2761 = vmatmul.mubr.bf16.gmra.mxu0 %v137_v56 }
  0x77   :  { %2764 = vmatprep.mubr.bf16.mxu0 %v138_v57 }
  0x7e   :  { %2765 = vmatmul.mubr.bf16.gmra.mxu0 %v139_v60 }
 0x106   :  { %v2738_v7 = vpop.f32.mrf.mxu0 }
 0x107   :  { %v254_v13 = vadd.f32 %v2738_v7, %v3628_v9 }
 0x108   :  { %v245_v8 = vpop.f32.mrf.mxu0 }
 0x109   :  { %v246_v11 = vadd.f32 %v3628_v9, %v245_v8  ;;  %v374_v20 = vmax.f32 %v254_v13, 0.0 }
 0x10a   :  { %v2739_v10 = vpop.f32.mrf.mxu0 }
 0x10b   :  { %v257_v12 = vadd.f32 %v2739_v10, %v3628_v9  ;;  %v372_v18 = vmax.f32 %v246_v11, 0.0 }
 0x10c   :  { %v248_v14 = vpop.f32.mrf.mxu0 }
 0x10d   :  { %v249_v15 = vadd.f32 %v3628_v9, %v248_v14  ;;  %v375_v16 = vmax.f32 %v257_v12, 0.0 }
 0x10e   :  { %v2742_v17 = vpop.f32.mrf.mxu0 }
 0x10f   :  { %v373_v19 = vmax.f32 %v249_v15, 0.0  ;;  %v405_v23 = vpack.c.bf16 %v375_v16, %v374_v20  ;;  %v270_v27 = vadd.f32 %v2742_v17, %v3628_v9 }
 0x110   :  { %v261_v21 = vpop.f32.mrf.mxu0 }
 0x111   :  { %v404_v22 = vpack.c.bf16 %v373_v19, %v372_v18  ;;  %v262_v25 = vadd.f32 %v3628_v9, %v261_v21  ;;  %v378_v34 = vmax.f32 %v270_v27, 0.0 }
 0x112   :  { %v2743_v24 = vpop.f32.mrf.mxu0 }
 0x113   :  { %v273_v26 = vadd.f32 %v2743_v24, %v3628_v9  ;;  %2784 = vmatprep.mubr.bf16.mxu1 %v404_v22  ;;  %v376_v32 = vmax.f32 %v262_v25, 0.0 }
 0x114   :  { %v264_v28 = vpop.f32.mrf.mxu0  ;;  %2785 = vmatmul.mubr.bf16.vlgmr.msra.gmra.mxu1 %v405_v23 }
 0x115   :  { %v265_v29 = vadd.f32 %v3628_v9, %v264_v28  ;;  %v379_v30 = vmax.f32 %v273_v26, 0.0 }
 0x116   :  { %v2746_v31 = vpop.f32.mrf.mxu0 }
 0x117   :  { %v377_v33 = vmax.f32 %v265_v29, 0.0  ;;  %v407_v37 = vpack.c.bf16 %v379_v30, %v378_v34  ;;  %v286_v41 = vadd.f32 %v2746_v31, %v3628_v9 }
 0x118   :  { %v277_v35 = vpop.f32.mrf.mxu0 }
 0x119   :  { %v406_v36 = vpack.c.bf16 %v377_v33, %v376_v32  ;;  %v278_v39 = vadd.f32 %v3628_v9, %v277_v35  ;;  %v382_v48 = vmax.f32 %v286_v41, 0.0 }
 0x11a   :  { %v2747_v38 = vpop.f32.mrf.mxu0 }
 0x11b   :  { %v289_v40 = vadd.f32 %v2747_v38, %v3628_v9  ;;  %2788 = vmatprep.mubr.bf16.mxu1 %v406_v36  ;;  %v380_v46 = vmax.f32 %v278_v39, 0.0 }
 0x11c   :  { %v280_v42 = vpop.f32.mrf.mxu0  ;;  %2789 = vmatmul.mubr.bf16.gmra.mxu1 %v407_v37 }
 0x11d   :  { %v281_v43 = vadd.f32 %v3628_v9, %v280_v42  ;;  %v383_v44 = vmax.f32 %v289_v40, 0.0 }
 0x11e   :  { %v2750_v45 = vpop.f32.mrf.mxu0 }
 0x11f   :  { %v381_v47 = vmax.f32 %v281_v43, 0.0  ;;  %v409_v51 = vpack.c.bf16 %v383_v44, %v382_v48  ;;  %v302_v55 = vadd.f32 %v2750_v45, %v3628_v9 }
 0x120   :  { %v293_v49 = vpop.f32.mrf.mxu0 }
 0x121   :  { %v408_v50 = vpack.c.bf16 %v381_v47, %v380_v46  ;;  %v294_v53 = vadd.f32 %v3628_v9, %v293_v49  ;;  %v386_v62 = vmax.f32 %v302_v55, 0.0 }
 0x122   :  { %v2751_v52 = vpop.f32.mrf.mxu0 }
 0x123   :  { %v305_v54 = vadd.f32 %v2751_v52, %v3628_v9  ;;  %2792 = vmatprep.mubr.bf16.mxu1 %v408_v50  ;;  %v384_v60 = vmax.f32 %v294_v53, 0.0 }
 0x124   :  { %v296_v56 = vpop.f32.mrf.mxu0  ;;  %2793 = vmatmul.mubr.bf16.gmra.mxu1 %v409_v51 }
 0x125   :  { %v297_v57 = vadd.f32 %v3628_v9, %v296_v56  ;;  %v387_v58 = vmax.f32 %v305_v54, 0.0 }
 0x126   :  { %v2754_v59 = vpop.f32.mrf.mxu0 }
 0x127   :  { %v385_v61 = vmax.f32 %v297_v57, 0.0  ;;  %v411_v1 = vpack.c.bf16 %v387_v58, %v386_v62  ;;  %v318_v5 = vadd.f32 %v2754_v59, %v3628_v9  ;;  %v3027_v57 = vld [vmem:[%s4488_s6] sm:$0xff]  }
 0x128   :  { %v309_v63 = vpop.f32.mrf.mxu0  ;;  %2830 = vmatprep.subr.bf16.mxu0 %v3027_v57 }
 0x129   :  { %v410_v0 = vpack.c.bf16 %v385_v61, %v384_v60  ;;  %v310_v3 = vadd.f32 %v3628_v9, %v309_v63  ;;  %v390_v13 = vmax.f32 %v318_v5, 0.0  ;;  %2831 = vmatpush3.bf16.msra.mxu0 %v3027_v57 }
 0x12a   :  { %v2755_v2 = vpop.f32.mrf.mxu0 }
 0x12b   :  { %v321_v4 = vadd.f32 %v2755_v2, %v3628_v9  ;;  %2796 = vmatprep.mubr.bf16.mxu1 %v410_v0  ;;  %v388_v11 = vmax.f32 %v310_v3, 0.0 }
 0x12c   :  { %v312_v6 = vpop.f32.mrf.mxu0  ;;  %2797 = vmatmul.mubr.bf16.gmra.mxu1 %v411_v1 }
 0x12d   :  { %v313_v7 = vadd.f32 %v3628_v9, %v312_v6  ;;  %v391_v8 = vmax.f32 %v321_v4, 0.0 }
 0x12e   :  { %v2758_v10 = vpop.f32.mrf.mxu0 }
 0x12f   :  { %v389_v12 = vmax.f32 %v313_v7, 0.0  ;;  %v413_v16 = vpack.c.bf16 %v391_v8, %v390_v13  ;;  %v334_v20 = vadd.f32 %v2758_v10, %v3628_v9 }
 0x130   :  { %v325_v14 = vpop.f32.mrf.mxu0 }
 0x131   :  { %v412_v15 = vpack.c.bf16 %v389_v12, %v388_v11  ;;  %v326_v18 = vadd.f32 %v3628_v9, %v325_v14  ;;  %v394_v27 = vmax.f32 %v334_v20, 0.0 }
 0x132   :  { %v2759_v17 = vpop.f32.mrf.mxu0 }
 0x133   :  { %v337_v19 = vadd.f32 %v2759_v17, %v3628_v9  ;;  %2800 = vmatprep.mubr.bf16.mxu1 %v412_v15  ;;  %v392_v25 = vmax.f32 %v326_v18, 0.0 }
 0x134   :  { %v328_v21 = vpop.f32.mrf.mxu0  ;;  %2801 = vmatmul.mubr.bf16.gmra.mxu1 %v413_v16 }
 0x135   :  { %v329_v22 = vadd.f32 %v3628_v9, %v328_v21  ;;  %v395_v23 = vmax.f32 %v337_v19, 0.0 }
 0x136   :  { %v2762_v24 = vpop.f32.mrf.mxu0 }
 0x137   :  { %v393_v26 = vmax.f32 %v329_v22, 0.0  ;;  %v415_v30 = vpack.c.bf16 %v395_v23, %v394_v27  ;;  %v350_v34 = vadd.f32 %v2762_v24, %v3628_v9 }
 0x138   :  { %v341_v28 = vpop.f32.mrf.mxu0 }
 0x139   :  { %v414_v29 = vpack.c.bf16 %v393_v26, %v392_v25  ;;  %v342_v32 = vadd.f32 %v3628_v9, %v341_v28  ;;  %v398_v41 = vmax.f32 %v350_v34, 0.0 }
 0x13a   :  { %v2763_v31 = vpop.f32.mrf.mxu0 }
 0x13b   :  { %v353_v33 = vadd.f32 %v2763_v31, %v3628_v9  ;;  %2804 = vmatprep.mubr.bf16.mxu1 %v414_v29  ;;  %v396_v39 = vmax.f32 %v342_v32, 0.0 }
 0x13c   :  { %v344_v35 = vpop.f32.mrf.mxu0  ;;  %2805 = vmatmul.mubr.bf16.gmra.mxu1 %v415_v30 }
 0x13d   :  { %v345_v36 = vadd.f32 %v3628_v9, %v344_v35  ;;  %v399_v37 = vmax.f32 %v353_v33, 0.0 }
 0x13e   :  { %v2766_v38 = vpop.f32.mrf.mxu0 }
 0x13f   :  { %v397_v40 = vmax.f32 %v345_v36, 0.0  ;;  %v417_v44 = vpack.c.bf16 %v399_v37, %v398_v41  ;;  %v366_v48 = vadd.f32 %v2766_v38, %v3628_v9 }
 0x140   :  { %v357_v42 = vpop.f32.mrf.mxu0 }
 0x141   :  { %v416_v43 = vpack.c.bf16 %v397_v40, %v396_v39  ;;  %v358_v46 = vadd.f32 %v3628_v9, %v357_v42  ;;  %v402_v54 = vmax.f32 %v366_v48, 0.0 }
 0x142   :  { %v2767_v45 = vpop.f32.mrf.mxu0 }
 0x143   :  { %v369_v47 = vadd.f32 %v2767_v45, %v3628_v9  ;;  %2808 = vmatprep.mubr.bf16.mxu1 %v416_v43  ;;  %v400_v52 = vmax.f32 %v358_v46, 0.0 }
 0x144   :  { %v360_v49 = vpop.f32.mrf.mxu0  ;;  %2809 = vmatmul.mubr.bf16.gmra.mxu1 %v417_v44 }
 0x145   :  { %v361_v50 = vadd.f32 %v3628_v9, %v360_v49  ;;  %v403_v51 = vmax.f32 %v369_v47, 0.0  ;;  %v3668_v9 = vld [vmem:[%s4487_s5] ss:$0 sm:$0xff] }
 0x147   :  { %v401_v53 = vmax.f32 %v361_v50, 0.0  ;;  %v419_v56 = vpack.c.bf16 %v403_v51, %v402_v54 }
 0x149   :  { %v418_v55 = vpack.c.bf16 %v401_v53, %v400_v52 }
 0x14b   :  { %2812 = vmatprep.mubr.bf16.mxu1 %v418_v55 }
 0x14c   :  { %2813 = vmatmul.mubr.bf16.gmra.mxu1 %v419_v56 }
 0x1d4   :  { %v2786_v58 = vpop.f32.mrf.mxu1 }
 0x1d5   :  { %v534_v63 = vadd.f32 %v2786_v58, %v3668_v9 }
 0x1d6   :  { %v525_v59 = vpop.f32.mrf.mxu1 }
 0x1d7   :  { %v526_v61 = vadd.f32 %v3668_v9, %v525_v59  ;;  %v654_v6 = vmax.f32 %v534_v63, 0.0 }
 0x1d8   :  { %v2787_v60 = vpop.f32.mrf.mxu1 }
 0x1d9   :  { %v537_v62 = vadd.f32 %v2787_v60, %v3668_v9  ;;  %v652_v4 = vmax.f32 %v526_v61, 0.0 }
 0x1da   :  { %v528_v0 = vpop.f32.mrf.mxu1 }
 0x1db   :  { %v529_v1 = vadd.f32 %v3668_v9, %v528_v0  ;;  %v655_v2 = vmax.f32 %v537_v62, 0.0 }
 0x1dc   :  { %v2790_v3 = vpop.f32.mrf.mxu1 }
 0x1dd   :  { %v653_v5 = vmax.f32 %v529_v1, 0.0  ;;  %v685_v10 = vpack.c.bf16 %v655_v2, %v654_v6  ;;  %v550_v14 = vadd.f32 %v2790_v3, %v3668_v9 }
 0x1de   :  { %v541_v7 = vpop.f32.mrf.mxu1 }
 0x1df   :  { %v684_v8 = vpack.c.bf16 %v653_v5, %v652_v4  ;;  %v542_v12 = vadd.f32 %v3668_v9, %v541_v7  ;;  %v658_v21 = vmax.f32 %v550_v14, 0.0 }
 0x1e0   :  { %v2791_v11 = vpop.f32.mrf.mxu1 }
 0x1e1   :  { %v553_v13 = vadd.f32 %v2791_v11, %v3668_v9  ;;  %2832 = vmatprep.mubr.bf16.mxu0 %v684_v8  ;;  %v656_v19 = vmax.f32 %v542_v12, 0.0 }
 0x1e2   :  { %v544_v15 = vpop.f32.mrf.mxu1  ;;  %2833 = vmatmul.mubr.bf16.vlgmr.msra.gmra.mxu0 %v685_v10 }
 0x1e3   :  { %v545_v16 = vadd.f32 %v3668_v9, %v544_v15  ;;  %v659_v17 = vmax.f32 %v553_v13, 0.0 }
 0x1e4   :  { %v2794_v18 = vpop.f32.mrf.mxu1 }
 0x1e5   :  { %v657_v20 = vmax.f32 %v545_v16, 0.0  ;;  %v687_v24 = vpack.c.bf16 %v659_v17, %v658_v21  ;;  %v566_v28 = vadd.f32 %v2794_v18, %v3668_v9 }
 0x1e6   :  { %v557_v22 = vpop.f32.mrf.mxu1 }
 0x1e7   :  { %v686_v23 = vpack.c.bf16 %v657_v20, %v656_v19  ;;  %v558_v26 = vadd.f32 %v3668_v9, %v557_v22  ;;  %v662_v35 = vmax.f32 %v566_v28, 0.0 }
 0x1e8   :  { %v2795_v25 = vpop.f32.mrf.mxu1 }
 0x1e9   :  { %v569_v27 = vadd.f32 %v2795_v25, %v3668_v9  ;;  %2836 = vmatprep.mubr.bf16.mxu0 %v686_v23  ;;  %v660_v33 = vmax.f32 %v558_v26, 0.0 }
 0x1ea   :  { %v560_v29 = vpop.f32.mrf.mxu1  ;;  %2837 = vmatmul.mubr.bf16.gmra.mxu0 %v687_v24 }
 0x1eb   :  { %v561_v30 = vadd.f32 %v3668_v9, %v560_v29  ;;  %v663_v31 = vmax.f32 %v569_v27, 0.0 }
 0x1ec   :  { %v2798_v32 = vpop.f32.mrf.mxu1 }
 0x1ed   :  { %v661_v34 = vmax.f32 %v561_v30, 0.0  ;;  %v689_v38 = vpack.c.bf16 %v663_v31, %v662_v35  ;;  %v582_v42 = vadd.f32 %v2798_v32, %v3668_v9 }
 0x1ee   :  { %v573_v36 = vpop.f32.mrf.mxu1 }
 0x1ef   :  { %v688_v37 = vpack.c.bf16 %v661_v34, %v660_v33  ;;  %v574_v40 = vadd.f32 %v3668_v9, %v573_v36  ;;  %v666_v49 = vmax.f32 %v582_v42, 0.0 }
 0x1f0   :  { %v2799_v39 = vpop.f32.mrf.mxu1 }
 0x1f1   :  { %v585_v41 = vadd.f32 %v2799_v39, %v3668_v9  ;;  %2840 = vmatprep.mubr.bf16.mxu0 %v688_v37  ;;  %v664_v47 = vmax.f32 %v574_v40, 0.0 }
 0x1f2   :  { %v576_v43 = vpop.f32.mrf.mxu1  ;;  %2841 = vmatmul.mubr.bf16.gmra.mxu0 %v689_v38 }
 0x1f3   :  { %v577_v44 = vadd.f32 %v3668_v9, %v576_v43  ;;  %v667_v45 = vmax.f32 %v585_v41, 0.0 }
 0x1f4   :  { %v2802_v46 = vpop.f32.mrf.mxu1 }
 0x1f5   :  { %v665_v48 = vmax.f32 %v577_v44, 0.0  ;;  %v691_v52 = vpack.c.bf16 %v667_v45, %v666_v49  ;;  %v598_v56 = vadd.f32 %v2802_v46, %v3668_v9  ;;  %v3705_v44 = vld [vmem:[%s4489_s7] ss:$0 sm:$0xff] }
 0x1f6   :  { %v589_v50 = vpop.f32.mrf.mxu1 }
 0x1f7   :  { %v690_v51 = vpack.c.bf16 %v665_v48, %v664_v47  ;;  %v590_v54 = vadd.f32 %v3668_v9, %v589_v50  ;;  %v670_v63 = vmax.f32 %v598_v56, 0.0 }
 0x1f8   :  { %v2803_v53 = vpop.f32.mrf.mxu1 }
 0x1f9   :  { %v601_v55 = vadd.f32 %v2803_v53, %v3668_v9  ;;  %2844 = vmatprep.mubr.bf16.mxu0 %v690_v51  ;;  %v668_v61 = vmax.f32 %v590_v54, 0.0 }
 0x1fa   :  { %v592_v57 = vpop.f32.mrf.mxu1  ;;  %2845 = vmatmul.mubr.bf16.gmra.mxu0 %v691_v52 }
 0x1fb   :  { %v593_v58 = vadd.f32 %v3668_v9, %v592_v57  ;;  %v671_v59 = vmax.f32 %v601_v55, 0.0 }
 0x1fc   :  { %v2806_v60 = vpop.f32.mrf.mxu1 }
 0x1fd   :  { %v669_v62 = vmax.f32 %v593_v58, 0.0  ;;  %v693_v2 = vpack.c.bf16 %v671_v59, %v670_v63  ;;  %v614_v6 = vadd.f32 %v2806_v60, %v3668_v9 }
 0x1fe   :  { %v605_v0 = vpop.f32.mrf.mxu1 }
 0x1ff   :  { %v692_v1 = vpack.c.bf16 %v669_v62, %v668_v61  ;;  %v606_v4 = vadd.f32 %v3668_v9, %v605_v0  ;;  %v674_v14 = vmax.f32 %v614_v6, 0.0 }
 0x200   :  { %v2807_v3 = vpop.f32.mrf.mxu1 }
 0x201   :  { %v617_v5 = vadd.f32 %v2807_v3, %v3668_v9  ;;  %2848 = vmatprep.mubr.bf16.mxu0 %v692_v1  ;;  %v672_v12 = vmax.f32 %v606_v4, 0.0 }
 0x202   :  { %v608_v7 = vpop.f32.mrf.mxu1  ;;  %2849 = vmatmul.mubr.bf16.gmra.mxu0 %v693_v2 }
 0x203   :  { %v609_v8 = vadd.f32 %v3668_v9, %v608_v7  ;;  %v675_v10 = vmax.f32 %v617_v5, 0.0 }
 0x204   :  { %v2810_v11 = vpop.f32.mrf.mxu1 }
 0x205   :  { %v673_v13 = vmax.f32 %v609_v8, 0.0  ;;  %v695_v17 = vpack.c.bf16 %v675_v10, %v674_v14  ;;  %v630_v21 = vadd.f32 %v2810_v11, %v3668_v9 }
 0x206   :  { %v621_v15 = vpop.f32.mrf.mxu1 }
 0x207   :  { %v694_v16 = vpack.c.bf16 %v673_v13, %v672_v12  ;;  %v622_v19 = vadd.f32 %v3668_v9, %v621_v15  ;;  %v678_v28 = vmax.f32 %v630_v21, 0.0 }
 0x208   :  { %v2811_v18 = vpop.f32.mrf.mxu1 }
 0x209   :  { %v633_v20 = vadd.f32 %v2811_v18, %v3668_v9  ;;  %2852 = vmatprep.mubr.bf16.mxu0 %v694_v16  ;;  %v676_v26 = vmax.f32 %v622_v19, 0.0 }
 0x20a   :  { %v624_v22 = vpop.f32.mrf.mxu1  ;;  %2853 = vmatmul.mubr.bf16.gmra.mxu0 %v695_v17 }
 0x20b   :  { %v625_v23 = vadd.f32 %v3668_v9, %v624_v22  ;;  %v679_v24 = vmax.f32 %v633_v20, 0.0 }
 0x20c   :  { %v2814_v25 = vpop.f32.mrf.mxu1 }
 0x20d   :  { %v677_v27 = vmax.f32 %v625_v23, 0.0  ;;  %v697_v31 = vpack.c.bf16 %v679_v24, %v678_v28  ;;  %v646_v35 = vadd.f32 %v2814_v25, %v3668_v9 }
 0x20e   :  { %v637_v29 = vpop.f32.mrf.mxu1 }
 0x20f   :  { %v696_v30 = vpack.c.bf16 %v677_v27, %v676_v26  ;;  %v638_v33 = vadd.f32 %v3668_v9, %v637_v29  ;;  %v682_v41 = vmax.f32 %v646_v35, 0.0 }
 0x210   :  { %v2815_v32 = vpop.f32.mrf.mxu1 }
 0x211   :  { %v649_v34 = vadd.f32 %v2815_v32, %v3668_v9  ;;  %2856 = vmatprep.mubr.bf16.mxu0 %v696_v30  ;;  %v680_v39 = vmax.f32 %v638_v33, 0.0 }
 0x212   :  { %v640_v36 = vpop.f32.mrf.mxu1  ;;  %2857 = vmatmul.mubr.bf16.gmra.mxu0 %v697_v31 }
 0x213   :  { %v641_v37 = vadd.f32 %v3668_v9, %v640_v36  ;;  %v683_v38 = vmax.f32 %v649_v34, 0.0 }
 0x215   :  { %v681_v40 = vmax.f32 %v641_v37, 0.0  ;;  %v699_v43 = vpack.c.bf16 %v683_v38, %v682_v41 }
 0x217   :  { %v698_v42 = vpack.c.bf16 %v681_v40, %v680_v39 }
 0x219   :  { %2860 = vmatprep.mubr.bf16.mxu0 %v698_v42 }
 0x21a   :  { %2861 = vmatmul.mubr.bf16.gmra.mxu0 %v699_v43 }
 0x2a2   :  { %v2834_v45 = vpop.f32.mrf.mxu0 }
 0x2a3   :  { %v3708_v46 = vadd.f32 %v2834_v45, %v3705_v44 }
 0x2a4   :  { %v805_v47 = vpop.f32.mrf.mxu0 }
 0x2a5   :  { %v966_v9 = vand.u32 2147483647, %v3708_v46  ;;  %v3712_v48 = vadd.f32 %v3705_v44, %v805_v47 }
 0x2a6   :  { %v2835_v49 = vpop.f32.mrf.mxu0 }
 0x2a7   :  { %v998_v50 = vsub.f32 0.0, %v966_v9  ;;  %v964_v51 = vand.u32 2147483647, %v3712_v48  ;;  %v3716_v52 = vadd.f32 %v2835_v49, %v3705_v44 }
 0x2a8   :  { %v808_v53 = vpop.f32.mrf.mxu0 }
 0x2a9   :  { %v1032_v54 = vmul.f32 1.442695, %v998_v50  ;;  %v996_v55 = vsub.f32 0.0, %v964_v51  ;;  %v967_v56 = vand.u32 2147483647, %v3716_v52  ;;  %v3720_v57 = vadd.f32 %v3705_v44, %v808_v53 }
 0x2aa   :  { %v2838_v58 = vpop.f32.mrf.mxu0 }
 0x2ab   :  { %3044 = vpow2.f32 %v1032_v54  ;;  %v1028_v59 = vmul.f32 1.442695, %v996_v55  ;;  %v999_v60 = vsub.f32 0.0, %v967_v56  ;;  %v3723_v61 = vadd.f32 %v2838_v58, %v3705_v44 }
 0x2ac   :  { %v965_v62 = vand.u32 2147483647, %v3720_v57  ;;  %v821_v63 = vpop.f32.mrf.mxu0 }
 0x2ad   :  { %3046 = vpow2.f32 %v1028_v59  ;;  %v1034_v0 = vmul.f32 1.442695, %v999_v60  ;;  %v970_v1 = vand.u32 2147483647, %v3723_v61  ;;  %v3728_v3 = vadd.f32 %v3705_v44, %v821_v63 }
 0x2ae   :  { %v997_v2 = vsub.f32 0.0, %v965_v62  ;;  %v2839_v4 = vpop.f32.mrf.mxu0 }
 0x2af   :  { %3048 = vpow2.f32 %v1034_v0  ;;  %v1002_v5 = vsub.f32 0.0, %v970_v1  ;;  %v3731_v6 = vadd.f32 %v2839_v4, %v3705_v44  ;;  %v968_v8 = vand.u32 2147483647, %v3728_v3 }
 0x2b0   :  { %v1030_v7 = vmul.f32 1.442695, %v997_v2  ;;  %v824_v10 = vpop.f32.mrf.mxu0 }
 0x2b1   :  { %v1040_v11 = vmul.f32 1.442695, %v1002_v5  ;;  %v971_v12 = vand.u32 2147483647, %v3731_v6  ;;  %v3736_v13 = vadd.f32 %v3705_v44, %v824_v10  ;;  %v1000_v14 = vsub.f32 0.0, %v968_v8 }
 0x2b2   :  { %3050 = vpow2.f32 %v1030_v7  ;;  %v2842_v15 = vpop.f32.mrf.mxu0 }
 0x2b3   :  { %3052 = vpow2.f32 %v1040_v11  ;;  %v1003_v16 = vsub.f32 0.0, %v971_v12  ;;  %v969_v17 = vand.u32 2147483647, %v3736_v13  ;;  %v1036_v18 = vmul.f32 1.442695, %v1000_v14 }
 0x2b4   :  { %v3740_v19 = vadd.f32 %v2842_v15, %v3705_v44  ;;  %v837_v20 = vpop.f32.mrf.mxu0 }
 0x2b5   :  { %v1042_v21 = vmul.f32 1.442695, %v1003_v16  ;;  %v1001_v22 = vsub.f32 0.0, %v969_v17  ;;  %v3743_v23 = vadd.f32 %v3705_v44, %v837_v20  ;;  %3054 = vpow2.f32 %v1036_v18 }
 0x2b6   :  { %v974_v24 = vand.u32 2147483647, %v3740_v19  ;;  %v2843_v25 = vpop.f32.mrf.mxu0 }
 0x2b7   :  { %3056 = vpow2.f32 %v1042_v21  ;;  %v1038_v26 = vmul.f32 1.442695, %v1001_v22  ;;  %v972_v27 = vand.u32 2147483647, %v3743_v23  ;;  %v3748_v30 = vadd.f32 %v2843_v25, %v3705_v44 }
 0x2b8   :  { %v3045_v28 = vpop.eup %3044  ;;  %v1006_v29 = vsub.f32 0.0, %v974_v24  ;;  %v840_v31 = vpop.f32.mrf.mxu0 }
 0x2b9   :  { %v1094_v32 = vadd.f32 1.0, %v3045_v28  ;;  %3058 = vpow2.f32 %v1038_v26  ;;  %v1004_v33 = vsub.f32 0.0, %v972_v27  ;;  %v3751_v34 = vadd.f32 %v3705_v44, %v840_v31 }
 0x2ba   :  { %v3047_v35 = vpop.eup %3046  ;;  %v1048_v36 = vmul.f32 1.442695, %v1006_v29  ;;  %v975_v37 = vand.u32 2147483647, %v3748_v30  ;;  %v2846_v38 = vpop.f32.mrf.mxu0 }
 0x2bb   :  { %3060 = vlog2.f32 %v1094_v32  ;;  %v1092_v39 = vadd.f32 1.0, %v3047_v35  ;;  %v1044_v40 = vmul.f32 1.442695, %v1004_v33  ;;  %v973_v43 = vand.u32 2147483647, %v3751_v34 }
 0x2bc   :  { %v3049_v41 = vpop.eup %3048  ;;  %3062 = vpow2.f32 %v1048_v36  ;;  %v1007_v42 = vsub.f32 0.0, %v975_v37  ;;  %v3756_v45 = vadd.f32 %v2846_v38, %v3705_v44  ;;  %v853_v47 = vpop.f32.mrf.mxu0  ;;  %v934_v32 = vmax.f32 %v3708_v46, 0.0 }
 0x2bd   :  { %3064 = vlog2.f32 %v1092_v39  ;;  %v1095_v9 = vadd.f32 1.0, %v3049_v41  ;;  %v3759_v49 = vadd.f32 %v3705_v44, %v853_v47  ;;  %v1005_v51 = vsub.f32 0.0, %v973_v43 }
 0x2be   :  { %4502 = vst [vmem:[#allocation12_spill] sm:$0xff] %v3756_v45  ;;  %3066 = vpow2.f32 %v1044_v40  ;;  %v1050_v50 = vmul.f32 1.442695, %v1007_v42  ;;  %v2847_v53 = vpop.f32.mrf.mxu0  ;;  %v978_v55 = vand.u32 2147483647, %v3756_v45  ;;  %v932_v37 = vmax.f32 %v3712_v48, 0.0 }
 0x2bf   :  { %4503 = vst [vmem:[#allocation13_spill] sm:$0xff] %v3759_v49  ;;  %v3051_v54 = vpop.eup %3050  ;;  %3068 = vlog2.f32 %v1095_v9  ;;  %v976_v56 = vand.u32 2147483647, %v3759_v49  ;;  %v1046_v60 = vmul.f32 1.442695, %v1005_v51  ;;  %v3764_v62 = vadd.f32 %v2847_v53, %v3705_v44 }
 0x2c0   :  { %v3053_v58 = vpop.eup %3052  ;;  %v1093_v59 = vadd.f32 1.0, %v3051_v54  ;;  %3070 = vpow2.f32 %v1050_v50  ;;  %v856_v63 = vpop.f32.mrf.mxu0  ;;  %v1010_v1 = vsub.f32 0.0, %v978_v55  ;;  %v935_v50 = vmax.f32 %v3716_v52, 0.0 }
 0x2c1   :  { %4504 = vst [vmem:[#allocation14_spill] sm:$0xff] %v3764_v62  ;;  %v1098_v0 = vadd.f32 1.0, %v3053_v58  ;;  %v1008_v2 = vsub.f32 0.0, %v976_v56  ;;  %v3767_v4 = vadd.f32 %v3705_v44, %v856_v63  ;;  %v979_v5 = vand.u32 2147483647, %v3764_v62 }
 0x2c2   :  { %3072 = vlog2.f32 %v1093_v59  ;;  %v2850_v7 = vpop.f32.mrf.mxu0  ;;  %v3055_v8 = vpop.eup %3054  ;;  %v1056_v10 = vmul.f32 1.442695, %v1010_v1 }
 0x2c3   :  { %3074 = vlog2.f32 %v1098_v0  ;;  %v1052_v11 = vmul.f32 1.442695, %v1008_v2  ;;  %v1096_v14 = vadd.f32 1.0, %v3055_v8  ;;  %v1011_v15 = vsub.f32 0.0, %v979_v5 }
 0x2c4   :  { %v3057_v12 = vpop.eup %3056  ;;  %3076 = vpow2.f32 %v1046_v60  ;;  %v977_v16 = vand.u32 2147483647, %v3767_v4  ;;  %v869_v17 = vpop.f32.mrf.mxu0  ;;  %v3772_v20 = vadd.f32 %v2850_v7, %v3705_v44  ;;  %v933_v8 = vmax.f32 %v3720_v57, 0.0 }
 0x2c5   :  { %v1099_v18 = vadd.f32 1.0, %v3057_v12  ;;  %3078 = vpow2.f32 %v1056_v10  ;;  %v3775_v21 = vadd.f32 %v3705_v44, %v869_v17  ;;  %v1058_v26 = vmul.f32 1.442695, %v1011_v15 }
 0x2c6   :  { %4505 = vst [vmem:[#allocation15_spill] sm:$0xff] %v3772_v20  ;;  %v3059_v22 = vpop.eup %3058  ;;  %3080 = vlog2.f32 %v1096_v14  ;;  %v1009_v24 = vsub.f32 0.0, %v977_v16  ;;  %v982_v27 = vand.u32 2147483647, %v3772_v20  ;;  %v3781_v40 = vpop.f32.mrf.mxu0  ;;  %v938_v15 = vmax.f32 %v3723_v61, 0.0 }
 0x2c7   :  { %3082 = vlog2.f32 %v1099_v18  ;;  %v1097_v25 = vadd.f32 1.0, %v3059_v22  ;;  %v980_v29 = vand.u32 2147483647, %v3775_v21 }
 0x2c8   :  { %v3061_v28 = vpop.eup %3060  ;;  %3084 = vpow2.f32 %v1052_v11  ;;  %v1054_v35 = vmul.f32 1.442695, %v1009_v24  ;;  %v1014_v39 = vsub.f32 0.0, %v982_v27  ;;  %v872_v60 = vpop.f32.mrf.mxu0  ;;  %v936_v27 = vmax.f32 %v3728_v3, 0.0 }
 0x2c9   :  { %v3063_v31 = vpop.eup %3062  ;;  %v1129_v33 = vmul.f32 0.6931472, %v3061_v28  ;;  %3086 = vlog2.f32 %v1097_v25  ;;  %v1012_v47 = vsub.f32 0.0, %v980_v29 }
 0x2ca   :  { %v3065_v36 = vpop.eup %3064  ;;  %v1102_v38 = vadd.f32 1.0, %v3063_v31  ;;  %3088 = vpow2.f32 %v1058_v26  ;;  %v1064_v59 = vmul.f32 1.442695, %v1014_v39  ;;  %v3806_v24 = vpop.f32.mrf.mxu0 }
 0x2cb   :  { %v3067_v41 = vpop.eup %3066  ;;  %v1190_v42 = vadd.f32 %v1129_v33, %v934_v32  ;;  %v1125_v43 = vmul.f32 0.6931472, %v3065_v36  ;;  %v1060_v5 = vmul.f32 1.442695, %v1012_v47  ;;  %v939_v36 = vmax.f32 %v3731_v6, 0.0 }
 0x2cc   :  { %v3069_v9 = vpop.eup %3068  ;;  %3090 = vlog2.f32 %v1102_v38  ;;  %v1100_v51 = vadd.f32 1.0, %v3067_v41 }
 0x2cd   :  { %v3071_v53 = vpop.eup %3070  ;;  %v3784_v54 = vadd.f32 0.0001, %v1190_v42  ;;  %v1188_v55 = vadd.f32 %v1125_v43, %v932_v37  ;;  %v1131_v56 = vmul.f32 0.6931472, %v3069_v9  ;;  %3092 = vpow2.f32 %v1054_v35  ;;  %v3824_v43 = vpop.f32.mrf.mxu0 }
 0x2ce   :  { %3094 = vlog2.f32 %v1100_v51  ;;  %v1103_v58 = vadd.f32 1.0, %v3071_v53  ;;  %v937_v9 = vmax.f32 %v3736_v13, 0.0 }
 0x2cf   :  { %v3073_v63 = vpop.eup %3072  ;;  %v2436_v0 = vsel %vm1596_vm0, %v3708_v46, %v3784_v54  ;;  %v3789_v1 = vadd.f32 0.0001, %v1188_v55  ;;  %v1191_v2 = vadd.f32 %v1131_v56, %v935_v50 }
 0x2d0   :  { %v3075_v7 = vpop.eup %3074  ;;  %2469 = vst.msk [vmem:[%s4497_s15 + $0x10] sm:$0xff] %vm2466_vm1, %v2436_v0  ;;  %v1127_v10 = vmul.f32 0.6931472, %v3073_v63  ;;  %3096 = vlog2.f32 %v1103_v58  ;;  %v3844_v0 = vadd.f32 %v3781_v40, %v3705_v44 }
 0x2d1   :  { %v3077_v11 = vpop.eup %3076  ;;  %v2434_v12 = vsel %vm1596_vm0, %v3712_v48, %v3789_v1  ;;  %v3799_v14 = vadd.f32 0.0001, %v1191_v2  ;;  %v1137_v18 = vmul.f32 0.6931472, %v3075_v7  ;;  %3098 = vpow2.f32 %v1064_v59 }
 0x2d2   :  { %v3079_v16 = vpop.eup %3078  ;;  %2467 = vst.msk [vmem:[%s4497_s15] sm:$0xff] %vm2466_vm1, %v2434_v12  ;;  %v1189_v17 = vadd.f32 %v1127_v10, %v933_v8  ;;  %v1101_v22 = vadd.f32 1.0, %v3077_v11  ;;  %3100 = vpow2.f32 %v1060_v5  ;;  %v3850_v7 = vadd.f32 %v3705_v44, %v872_v60  ;;  %v3852_v8 = vpop.f32.mrf.mxu0 }
 0x2d3   :  { %v3081_v25 = vpop.eup %3080  ;;  %v2437_v26 = vsel %vm1596_vm0, %v3716_v52, %v3799_v14  ;;  %v1106_v28 = vadd.f32 1.0, %v3079_v16  ;;  %v1194_v32 = vadd.f32 %v1137_v18, %v938_v15  ;;  %v942_v12 = vmax.f32 %v3740_v19, 0.0 }
 0x2d4   :  { %v3083_v29 = vpop.eup %3082  ;;  %2470 = vst.msk [vmem:[%s4497_s15 + $0x18] sm:$0xff] %vm2466_vm1, %v2437_v26  ;;  %v3816_v31 = vadd.f32 0.0001, %v1189_v17  ;;  %v1133_v33 = vmul.f32 0.6931472, %v3081_v25  ;;  %3102 = vlog2.f32 %v1101_v22  ;;  %v940_v60 = vmax.f32 %v3743_v23, 0.0 }
 0x2d5   :  { %v3085_v35 = vpop.eup %3084  ;;  %v1139_v37 = vmul.f32 0.6931472, %v3083_v29  ;;  %3104 = vlog2.f32 %v1106_v28  ;;  %v3822_v41 = vadd.f32 0.0001, %v1194_v32  ;;  %v983_v26 = vand.u32 2147483647, %v3844_v0 }
 0x2d6   :  { %v3087_v38 = vpop.eup %3086  ;;  %v2435_v39 = vsel %vm1596_vm0, %v3720_v57, %v3816_v31  ;;  %v1192_v42 = vadd.f32 %v1133_v33, %v936_v27  ;;  %v1104_v51 = vadd.f32 1.0, %v3085_v35  ;;  %v943_v28 = vmax.f32 %v3748_v30, 0.0  ;;  %v888_v33 = vpop.f32.mrf.mxu0 }
 0x2d7   :  { %2468 = vst.msk [vmem:[%s4497_s15 + $0x8] sm:$0xff] %vm2466_vm1, %v2435_v39  ;;  %v1195_v47 = vadd.f32 %v1139_v37, %v939_v36  ;;  %v1135_v50 = vmul.f32 0.6931472, %v3087_v38  ;;  %v3089_v53 = vpop.eup %3088  ;;  %v2440_v55 = vsel %vm1596_vm0, %v3723_v61, %v3822_v41  ;;  %v981_v32 = vand.u32 2147483647, %v3850_v7 }
 0x2d8   :  { %v3834_v56 = vadd.f32 0.0001, %v1192_v42  ;;  %2473 = vst.msk [vmem:[%s4497_s15 + $0x30] sm:$0xff] %vm2466_vm1, %v2440_v55  ;;  %3106 = vlog2.f32 %v1104_v51  ;;  %v1107_v17 = vadd.f32 1.0, %v3089_v53  ;;  %v946_v51 = vmax.f32 %v3756_v45, 0.0 }
 0x2d9   :  { %v3091_v58 = vpop.eup %3090  ;;  %v3840_v59 = vadd.f32 0.0001, %v1195_v47  ;;  %v1193_v63 = vadd.f32 %v1135_v50, %v937_v9  ;;  %v941_v50 = vmax.f32 %v3751_v34, 0.0  ;;  %v1015_v53 = vsub.f32 0.0, %v983_v26 }
 0x2da   :  { %v3093_v2 = vpop.eup %3092  ;;  %v2438_v5 = vsel %vm1596_vm0, %v3728_v3, %v3834_v56  ;;  %v1145_v15 = vmul.f32 0.6931472, %v3091_v58  ;;  %3108 = vlog2.f32 %v1107_v17 }
 0x2db   :  { %v3095_v10 = vpop.eup %3094  ;;  %2471 = vst.msk [vmem:[%s4497_s15 + $0x20] sm:$0xff] %vm2466_vm1, %v2438_v5  ;;  %v2441_v40 = vsel %vm1596_vm0, %v3731_v6, %v3840_v59  ;;  %v3861_v11 = vadd.f32 0.0001, %v1193_v63  ;;  %v1105_v37 = vadd.f32 1.0, %v3093_v2  ;;  %v1013_v5 = vsub.f32 0.0, %v981_v32 }
 0x2dc   :  { %2474 = vst.msk [vmem:[%s4497_s15 + $0x38] sm:$0xff] %vm2466_vm1, %v2441_v40  ;;  %v1141_v16 = vmul.f32 0.6931472, %v3095_v10  ;;  %v1198_v25 = vadd.f32 %v1145_v15, %v942_v12  ;;  %v2858_v10 = vpop.f32.mrf.mxu0  ;;  %v3903_v15 = vadd.f32 %v3806_v24, %v3705_v44  ;;  %v1066_v24 = vmul.f32 1.442695, %v1015_v53 }
 0x2dd   :  { %v3097_v18 = vpop.eup %3096  ;;  %v2439_v22 = vsel %vm1596_vm0, %v3736_v13, %v3861_v11  ;;  %3110 = vlog2.f32 %v1105_v37 }
 0x2de   :  { %2472 = vst.msk [vmem:[%s4497_s15 + $0x28] sm:$0xff] %vm2466_vm1, %v2439_v22  ;;  %v1196_v27 = vadd.f32 %v1141_v16, %v940_v60  ;;  %v1147_v29 = vmul.f32 0.6931472, %v3097_v18  ;;  %v3099_v35 = vpop.eup %3098  ;;  %v3879_v36 = vadd.f32 0.0001, %v1198_v25  ;;  %v944_v18 = vmax.f32 %v3759_v49, 0.0  ;;  %v901_v32 = vpop.f32.mrf.mxu0 }
 0x2df   :  { %v3101_v38 = vpop.eup %3100  ;;  %v1110_v12 = vadd.f32 1.0, %v3099_v35  ;;  %v986_v25 = vand.u32 2147483647, %v3903_v15 }
 0x2e0   :  { %v3881_v39 = vadd.f32 0.0001, %v1196_v27  ;;  %v1199_v42 = vadd.f32 %v1147_v29, %v943_v28  ;;  %v2444_v9 = vsel %vm1596_vm0, %v3740_v19, %v3879_v36  ;;  %v1108_v22 = vadd.f32 1.0, %v3101_v38 }
 0x2e1   :  { %v3103_v47 = vpop.eup %3102  ;;  %2477 = vst.msk [vmem:[%s4497_s15 + $0x50] sm:$0xff] %vm2466_vm1, %v2444_v9  ;;  %v1062_v28 = vmul.f32 1.442695, %v1013_v5  ;;  %v3918_v29 = vadd.f32 %v3705_v44, %v3824_v43  ;;  %3112 = vlog2.f32 %v1110_v12  ;;  %v3947_v5 = vadd.f32 %v2858_v10, %v3705_v44 }
 0x2e2   :  { %v3105_v55 = vpop.eup %3104  ;;  %v2442_v58 = vsel %vm1596_vm0, %v3743_v23, %v3881_v39  ;;  %v3895_v63 = vadd.f32 0.0001, %v1199_v42  ;;  %v1143_v2 = vmul.f32 0.6931472, %v3103_v47  ;;  %v1018_v42 = vsub.f32 0.0, %v986_v25 }
 0x2e3   :  { %2475 = vst.msk [vmem:[%s4497_s15 + $0x40] sm:$0xff] %vm2466_vm1, %v2442_v58  ;;  %v1153_v40 = vmul.f32 0.6931472, %v3105_v55  ;;  %3114 = vlog2.f32 %v1108_v22  ;;  %v3941_v55 = vadd.f32 %v3852_v8, %v3705_v44 }
 0x2e4   :  { %v2445_v60 = vsel %vm1596_vm0, %v3748_v30, %v3895_v63  ;;  %v1197_v16 = vadd.f32 %v1143_v2, %v941_v50  ;;  %3116 = vpow2.f32 %v1066_v24  ;;  %v1072_v9 = vmul.f32 1.442695, %v1018_v42 }
 0x2e5   :  { %2478 = vst.msk [vmem:[%s4497_s15 + $0x58] sm:$0xff] %vm2466_vm1, %v2445_v60  ;;  %v1202_v17 = vadd.f32 %v1153_v40, %v946_v51  ;;  %v3107_v26 = vpop.eup %3106  ;;  %v984_v50 = vand.u32 2147483647, %v3918_v29  ;;  %v2859_v51 = vpop.f32.mrf.mxu0  ;;  %3118 = vpow2.f32 %v1062_v28  ;;  %v3944_v2 = vadd.f32 %v3705_v44, %v888_v33 }
 0x2e6   :  { %v3914_v27 = vadd.f32 0.0001, %v1197_v16  ;;  %v1149_v37 = vmul.f32 0.6931472, %v3107_v26  ;;  %v947_v60 = vmax.f32 %v3764_v62, 0.0  ;;  %3120 = vpow2.f32 %v1072_v9 }
 0x2e7   :  { %v3920_v35 = vadd.f32 0.0001, %v1202_v17  ;;  %v1016_v58 = vsub.f32 0.0, %v984_v50  ;;  %v3109_v40 = vpop.eup %3108  ;;  %v987_v33 = vand.u32 2147483647, %v3941_v55  ;;  %v904_v17 = vpop.f32.mrf.mxu0  ;;  %v945_v24 = vmax.f32 %v3767_v4, 0.0 }
 0x2e8   :  { %v2443_v38 = vsel %vm1596_vm0, %v3751_v34, %v3914_v27  ;;  %v1200_v47 = vadd.f32 %v1149_v37, %v944_v18  ;;  %v1155_v8 = vmul.f32 0.6931472, %v3109_v40  ;;  %v985_v10 = vand.u32 2147483647, %v3944_v2 }
 0x2e9   :  { %2476 = vst.msk [vmem:[%s4497_s15 + $0x48] sm:$0xff] %vm2466_vm1, %v2443_v38  ;;  %v2448_v43 = vsel %vm1596_vm0, %v3756_v45, %v3920_v35  ;;  %v1068_v16 = vmul.f32 1.442695, %v1016_v58  ;;  %v1019_v25 = vsub.f32 0.0, %v987_v33  ;;  %v990_v26 = vand.u32 2147483647, %v3947_v5  ;;  %v2862_v50 = vpop.f32.mrf.mxu0 }
 0x2ea   :  { %2481 = vst.msk [vmem:[%s4497_s15 + $0x70] sm:$0xff] %vm2466_vm1, %v2448_v43  ;;  %v3937_v53 = vadd.f32 0.0001, %v1200_v47  ;;  %v3111_v18 = vpop.eup %3110  ;;  %v1203_v22 = vadd.f32 %v1155_v8, %v947_v60  ;;  %v1017_v37 = vsub.f32 0.0, %v985_v10  ;;  %v3962_v42 = vadd.f32 %v3705_v44, %v901_v32 }
 0x2eb   :  { %3122 = vpow2.f32 %v1068_v16  ;;  %v1151_v28 = vmul.f32 0.6931472, %v3111_v18  ;;  %v1074_v43 = vmul.f32 1.442695, %v1019_v25  ;;  %v1022_v47 = vsub.f32 0.0, %v990_v26  ;;  %v917_v26 = vpop.f32.mrf.mxu0 }
 0x2ec   :  { %v2446_v12 = vsel %vm1596_vm0, %v3759_v49, %v3937_v53  ;;  %v3964_v38 = vadd.f32 0.0001, %v1203_v22  ;;  %v3967_v9 = vadd.f32 %v2859_v51, %v3705_v44  ;;  %v1070_v40 = vmul.f32 1.442695, %v1017_v37 }
 0x2ed   :  { %2479 = vst.msk [vmem:[%s4497_s15 + $0x60] sm:$0xff] %vm2466_vm1, %v2446_v12  ;;  %v1201_v58 = vadd.f32 %v1151_v28, %v945_v24  ;;  %v988_v12 = vand.u32 2147483647, %v3962_v42  ;;  %v950_v32 = vmax.f32 %v3772_v20, 0.0  ;;  %3124 = vpow2.f32 %v1074_v43 }
 0x2ee   :  { %v3113_v60 = vpop.eup %3112  ;;  %v2449_v8 = vsel %vm1596_vm0, %v3764_v62, %v3964_v38  ;;  %v1080_v16 = vmul.f32 1.442695, %v1022_v47  ;;  %3126 = vpow2.f32 %v1070_v40  ;;  %v948_v22 = vmax.f32 %v3775_v21, 0.0 }
 0x2ef   :  { %2482 = vst.msk [vmem:[%s4497_s15 + $0x78] sm:$0xff] %vm2466_vm1, %v2449_v8  ;;  %v3978_v51 = vadd.f32 0.0001, %v1201_v58  ;;  %v1161_v33 = vmul.f32 0.6931472, %v3113_v60  ;;  %v1020_v10 = vsub.f32 0.0, %v988_v12  ;;  %v3994_v62 = vadd.f32 %v3705_v44, %v904_v17 }
 0x2f0   :  { %v3115_v18 = vpop.eup %3114  ;;  %3128 = vpow2.f32 %v1080_v16  ;;  %v991_v25 = vand.u32 2147483647, %v3967_v9  ;;  %v1255_v28 = vmul.f32 0.5, %v3799_v14  ;;  %v1253_v40 = vmul.f32 0.5, %v3816_v31 }
 0x2f1   :  { %v3117_v24 = vpop.eup %3116  ;;  %v2447_v37 = vsel %vm1596_vm0, %v3767_v4, %v3978_v51  ;;  %v1206_v43 = vadd.f32 %v1161_v33, %v950_v32  ;;  %v1157_v47 = vmul.f32 0.6931472, %v3115_v18  ;;  %v1076_v14 = vmul.f32 1.442695, %v1020_v10  ;;  %v2863_v32 = vpop.f32.mrf.mxu0 }
 0x2f2   :  { %v3119_v58 = vpop.eup %3118  ;;  %2480 = vst.msk [vmem:[%s4497_s15 + $0x68] sm:$0xff] %vm2466_vm1, %v2447_v37  ;;  %v1111_v12 = vadd.f32 1.0, %v3117_v24  ;;  %v1023_v45 = vsub.f32 0.0, %v991_v25  ;;  %v1290_v18 = vmul.f32 1.442695, %v1255_v28  ;;  %v4002_v24 = vadd.f32 %v2862_v50, %v3705_v44 }
 0x2f3   :  { %v3991_v60 = vadd.f32 0.0001, %v1206_v43  ;;  %v1204_v8 = vadd.f32 %v1157_v47, %v948_v22  ;;  %v1109_v16 = vadd.f32 1.0, %v3119_v58  ;;  %v3121_v33 = vpop.eup %3120  ;;  %v1254_v22 = vmul.f32 0.5, %v3784_v54  ;;  %v920_v47 = vpop.f32.mrf.mxu0 }
 0x2f4   :  { %3130 = vlog2.f32 %v1111_v12  ;;  %v1114_v17 = vadd.f32 1.0, %v3121_v33  ;;  %v989_v10 = vand.u32 2147483647, %v3994_v62  ;;  %v1286_v28 = vmul.f32 1.442695, %v1253_v40 }
 0x2f5   :  { %v2452_v31 = vsel %vm1596_vm0, %v3772_v20, %v3991_v60  ;;  %v3999_v49 = vadd.f32 0.0001, %v1204_v8  ;;  %3132 = vlog2.f32 %v1109_v16  ;;  %v1082_v50 = vmul.f32 1.442695, %v1023_v45 }
 0x2f6   :  { %2485 = vst.msk [vmem:[%s4497_s15 + $0x90] sm:$0xff] %vm2466_vm1, %v2452_v31  ;;  %3134 = vpow2.f32 %v1076_v14  ;;  %v1021_v43 = vsub.f32 0.0, %v989_v10  ;;  %v994_v58 = vand.u32 2147483647, %v4002_v24  ;;  %v4019_v40 = vadd.f32 %v3705_v44, %v917_v26 }
 0x2f7   :  { %v2450_v37 = vsel %vm1596_vm0, %v3775_v21, %v3999_v49  ;;  %3136 = vlog2.f32 %v1114_v17  ;;  %v1288_v12 = vmul.f32 1.442695, %v1254_v22  ;;  %v4022_v16 = vadd.f32 %v2863_v32, %v3705_v44 }
 0x2f8   :  { %v3123_v25 = vpop.eup %3122  ;;  %2483 = vst.msk [vmem:[%s4497_s15 + $0x80] sm:$0xff] %vm2466_vm1, %v2450_v37  ;;  %3138 = vpow2.f32 %v1290_v18  ;;  %v1078_v8 = vmul.f32 1.442695, %v1021_v43  ;;  %v1026_v33 = vsub.f32 0.0, %v994_v58  ;;  %v992_v31 = vand.u32 2147483647, %v4019_v40 }
 0x2f9   :  { %v1112_v54 = vadd.f32 1.0, %v3123_v25  ;;  %v4026_v45 = vadd.f32 %v3705_v44, %v920_v47  ;;  %v1252_v17 = vmul.f32 0.5, %v3789_v1  ;;  %v995_v26 = vand.u32 2147483647, %v4022_v16 }
 0x2fa   :  { %v3125_v14 = vpop.eup %3124  ;;  %v1088_v32 = vmul.f32 1.442695, %v1026_v33  ;;  %v1024_v37 = vsub.f32 0.0, %v992_v31  ;;  %v1256_v47 = vmul.f32 0.5, %v3834_v56  ;;  %v1257_v33 = vmul.f32 0.5, %v3861_v11 }
 0x2fb   :  { %3140 = vlog2.f32 %v1112_v54  ;;  %v3127_v18 = vpop.eup %3126  ;;  %v1115_v10 = vadd.f32 1.0, %v3125_v14  ;;  %v1258_v54 = vmul.f32 0.5, %v3822_v41  ;;  %v1027_v43 = vsub.f32 0.0, %v995_v26 }
 0x2fc   :  { %3142 = vpow2.f32 %v1286_v28  ;;  %v1113_v25 = vadd.f32 1.0, %v3127_v18  ;;  %v1588_v28 = vld [vmem:[%s4490_s8] sm:$0xf]  ;;  %v1084_v1 = vmul.f32 1.442695, %v1024_v37  ;;  %v951_v31 = vmax.f32 %v3844_v0, 0.0 }
 0x2fd   :  { %3144 = vpow2.f32 %v1082_v50  ;;  %v3129_v22 = vpop.eup %3128  ;;  %v993_v50 = vand.u32 2147483647, %v4026_v45  ;;  %v1090_v58 = vmul.f32 1.442695, %v1027_v43  ;;  %2994 = vmatprep.subr.msk.bf16.mxu1 %vm1645_vm2, %v1588_v28  ;;  %v1284_v18 = vmul.f32 1.442695, %v1252_v17 }
 0x2fe   :  { %3146 = vpow2.f32 %v1078_v8  ;;  %v1118_v44 = vadd.f32 1.0, %v3129_v22  ;;  %v1647_v8 = vsel %vm1645_vm2, %v1588_v28, 0  ;;  %v949_v26 = vmax.f32 %v3850_v7, 0.0 }
 0x2ff   :  { %3148 = vlog2.f32 %v1115_v10  ;;  %v1025_v41 = vsub.f32 0.0, %v993_v50  ;;  %2865 = vmatpush3.bf16.msra.mxu1 %v1647_v8  ;;  %v1259_v56 = vmul.f32 0.5, %v3840_v59  ;;  %v954_v50 = vmax.f32 %v3903_v15, 0.0 }
 0x300   :  { %3150 = vlog2.f32 %v1113_v25  ;;  %v1296_v25 = vmul.f32 1.442695, %v1258_v54 }
 0x301   :  { %3152 = vlog2.f32 %v1118_v44  ;;  %v3131_v14 = vpop.eup %3130  ;;  %v1086_v37 = vmul.f32 1.442695, %v1025_v41  ;;  %v1292_v44 = vmul.f32 1.442695, %v1256_v47  ;;  %v1261_v47 = vmul.f32 0.5, %v3914_v27 }
 0x302   :  { %3154 = vpow2.f32 %v1088_v32  ;;  %v1163_v10 = vmul.f32 0.6931472, %v3131_v14  ;;  %v3133_v22 = vpop.eup %3132  ;;  %v1294_v32 = vmul.f32 1.442695, %v1257_v33 }
 0x303   :  { %3156 = vpow2.f32 %v1084_v1  ;;  %v3135_v28 = vpop.eup %3134  ;;  %v1159_v11 = vmul.f32 0.6931472, %v3133_v22 }
 0x304   :  { %3158 = vpow2.f32 %v1090_v58  ;;  %v1207_v43 = vadd.f32 %v1163_v10, %v951_v31  ;;  %v3137_v20 = vpop.eup %3136  ;;  %v1116_v17 = vadd.f32 1.0, %v3135_v28  ;;  %v1298_v58 = vmul.f32 1.442695, %v1259_v56 }
 0x305   :  { %3160 = vpow2.f32 %v1288_v12  ;;  %v4041_v8 = vpop.eup %3138  ;;  %v1205_v54 = vadd.f32 %v1159_v11, %v949_v26  ;;  %v1169_v14 = vmul.f32 0.6931472, %v3137_v20  ;;  %v952_v20 = vmax.f32 %v3918_v29, 0.0 }
 0x306   :  { %3162 = vpow2.f32 %v1086_v37  ;;  %v4043_v1 = vadd.f32 0.0001, %v1207_v43  ;;  %v1260_v26 = vmul.f32 0.5, %v3881_v39  ;;  %v1302_v37 = vmul.f32 1.442695, %v1261_v47 }
 0x307   :  { %3164 = vpow2.f32 %v1284_v18  ;;  %v4051_v33 = vadd.f32 0.0001, %v1205_v54  ;;  %v1210_v41 = vadd.f32 %v1169_v14, %v954_v50  ;;  %v955_v11 = vmax.f32 %v3941_v55, 0.0 }
 0x308   :  { %v3141_v59 = vpop.eup %3140  ;;  %3166 = vlog2.f32 %v1116_v17  ;;  %v2453_v12 = vsel %vm1596_vm0, %v3844_v0, %v4043_v1  ;;  %v1262_v47 = vmul.f32 0.5, %v3879_v36 }
 0x309   :  { %v4046_v31 = vpop.eup %3142  ;;  %3168 = vpow2.f32 %v1296_v25  ;;  %2486 = vst.msk [vmem:[%s4497_s15 + $0x98] sm:$0xff] %vm2466_vm1, %v2453_v12  ;;  %v1165_v27 = vmul.f32 0.6931472, %v3141_v59  ;;  %v2451_v22 = vsel %vm1596_vm0, %v3850_v7, %v4051_v33  ;;  %v4062_v25 = vadd.f32 0.0001, %v1210_v41 }
 0x30a   :  { %v3145_v10 = vpop.eup %3144  ;;  %3170 = vpow2.f32 %v1292_v44  ;;  %2484 = vst.msk [vmem:[%s4497_s15 + $0x88] sm:$0xff] %vm2466_vm1, %v2451_v22  ;;  %v1300_v12 = vmul.f32 1.442695, %v1260_v26  ;;  %v958_v41 = vmax.f32 %v3947_v5, 0.0 }
 0x30b   :  { %v3147_v18 = vpop.eup %3146  ;;  %3172 = vpow2.f32 %v1294_v32  ;;  %v1208_v28 = vadd.f32 %v1165_v27, %v952_v20  ;;  %v1119_v44 = vadd.f32 1.0, %v3145_v10  ;;  %v2456_v39 = vsel %vm1596_vm0, %v3903_v15, %v4062_v25 }
 0x30c   :  { %v3149_v56 = vpop.eup %3148  ;;  %3174 = vpow2.f32 %v1298_v58  ;;  %v953_v32 = vmax.f32 %v3944_v2, 0.0  ;;  %v1117_v50 = vadd.f32 1.0, %v3147_v18  ;;  %2489 = vst.msk [vmem:[%s4497_s15 + $0xb0] sm:$0xff] %vm2466_vm1, %v2456_v39  ;;  %v1263_v27 = vmul.f32 0.5, %v3895_v63 }
 0x30d   :  { %v3151_v43 = vpop.eup %3150  ;;  %v4077_v54 = vadd.f32 0.0001, %v1208_v28  ;;  %v1171_v14 = vmul.f32 0.6931472, %v3149_v56  ;;  %3176 = vlog2.f32 %v1119_v44 }
 0x30e   :  { %v3153_v17 = vpop.eup %3152  ;;  %v1167_v59 = vmul.f32 0.6931472, %v3151_v43  ;;  %3178 = vpow2.f32 %v1302_v37  ;;  %v1265_v43 = vmul.f32 0.5, %v3978_v51 }
 0x30f   :  { %v3155_v58 = vpop.eup %3154  ;;  %v1177_v10 = vmul.f32 0.6931472, %v3153_v17  ;;  %v2454_v18 = vsel %vm1596_vm0, %v3918_v29, %v4077_v54  ;;  %v1211_v22 = vadd.f32 %v1171_v14, %v955_v11  ;;  %3180 = vlog2.f32 %v1117_v50 }
 0x310   :  { %v3157_v20 = vpop.eup %3156  ;;  %v1209_v28 = vadd.f32 %v1167_v59, %v953_v32  ;;  %2487 = vst.msk [vmem:[%s4497_s15 + $0xa0] sm:$0xff] %vm2466_vm1, %v2454_v18  ;;  %v1122_v26 = vadd.f32 1.0, %v3155_v58  ;;  %v1304_v32 = vmul.f32 1.442695, %v1262_v47  ;;  %v1306_v58 = vmul.f32 1.442695, %v1263_v27 }
 0x311   :  { %v3159_v39 = vpop.eup %3158  ;;  %v1214_v36 = vadd.f32 %v1177_v10, %v958_v41  ;;  %v1120_v56 = vadd.f32 1.0, %v3157_v20  ;;  %v4090_v63 = vadd.f32 0.0001, %v1211_v22  ;;  %v1266_v41 = vmul.f32 0.5, %v3920_v35 }
 0x312   :  { %v3161_v44 = vpop.eup %3160  ;;  %v4092_v17 = vadd.f32 0.0001, %v1209_v28  ;;  %3182 = vlog2.f32 %v1122_v26  ;;  %v1123_v37 = vadd.f32 1.0, %v3159_v39  ;;  %v1264_v50 = vmul.f32 0.5, %v3937_v53 }
 0x313   :  { %v3163_v11 = vpop.eup %3162  ;;  %v4094_v14 = vadd.f32 0.0001, %v1214_v36  ;;  %1416 = vrot.lane.b32.xlu1 %v3161_v44, %s3391_s21  ;;  %3184 = vpow2.f32 %v1300_v12  ;;  %v2457_v51 = vsel %vm1596_vm0, %v3941_v55, %v4090_v63  ;;  %v1310_v20 = vmul.f32 1.442695, %v1265_v43 }
 0x314   :  { %v3165_v59 = vpop.eup %3164  ;;  %2490 = vst.msk [vmem:[%s4497_s15 + $0xb8] sm:$0xff] %vm2466_vm1, %v2457_v51  ;;  %v2455_v47 = vsel %vm1596_vm0, %v3944_v2, %v4092_v17  ;;  %3186 = vlog2.f32 %v1120_v56  ;;  %v956_v53 = vmax.f32 %v3962_v42, 0.0  ;;  %v1267_v22 = vmul.f32 0.5, %v3964_v38 }
 0x315   :  { %v3167_v10 = vpop.eup %3166  ;;  %v2460_v35 = vsel %vm1596_vm0, %v3947_v5, %v4094_v14  ;;  %1412 = vrot.lane.b32.xlu0 %v3165_v59, %s3391_s21  ;;  %2488 = vst.msk [vmem:[%s4497_s15 + $0xa8] sm:$0xff] %vm2466_vm1, %v2455_v47  ;;  %3188 = vlog2.f32 %v1123_v37  ;;  %v1121_v28 = vadd.f32 1.0, %v3163_v11  ;;  %v1308_v56 = vmul.f32 1.442695, %v1264_v50 }
 0x316   :  { %v3169_v12 = vpop.eup %3168  ;;  %2493 = vst.msk [vmem:[%s4497_s15 + $0xd0] sm:$0xff] %vm2466_vm1, %v2460_v35  ;;  %v1173_v27 = vmul.f32 0.6931472, %v3167_v10  ;;  %3190 = vpow2.f32 %v1304_v32  ;;  %v1312_v44 = vmul.f32 1.442695, %v1266_v41  ;;  %v1269_v38 = vmul.f32 0.5, %v4051_v33 }
 0x317   :  { %v3171_v18 = vpop.eup %3170  ;;  %1418 = vrot.lane.b32.xlu1 %v4041_v8, %s3391_s21  ;;  %3192 = vpow2.f32 %v1306_v58  ;;  %v1314_v59 = vmul.f32 1.442695, %v1267_v22  ;;  %v959_v11 = vmax.f32 %v3967_v9, 0.0  ;;  %v1271_v50 = vmul.f32 0.5, %v4043_v1 }
 0x318   :  { %v3173_v39 = vpop.eup %3172  ;;  %v1212_v36 = vadd.f32 %v1173_v27, %v956_v53  ;;  %3194 = vpow2.f32 %v1310_v20  ;;  %v1318_v51 = vmul.f32 1.442695, %v1269_v38  ;;  %v1270_v53 = vmul.f32 0.5, %v3991_v60 }
 0x319   :  { %v3175_v26 = vpop.eup %3174  ;;  %1414 = vrot.lane.b32.xlu0 %v4046_v31, %s3391_s21  ;;  %3196 = vlog2.f32 %v1121_v28  ;;  %v1268_v31 = vmul.f32 0.5, %v3999_v49  ;;  %v957_v49 = vmax.f32 %v3994_v62, 0.0  ;;  %v1273_v60 = vmul.f32 0.5, %v4092_v17 }
 0x31a   :  { %v4127_v43 = vadd.f32 0.0001, %v1212_v36  ;;  %v3177_v37 = vpop.eup %3176  ;;  %3198 = vpow2.f32 %v1308_v56  ;;  %v960_v36 = vmax.f32 %v4019_v40, 0.0 }
 0x31b   :  { %1422 = vrot.lane.b32.xlu1 %v3173_v39, %s3391_s21  ;;  %v1179_v32 = vmul.f32 0.6931472, %v3177_v37  ;;  %v3179_v33 = vpop.eup %3178  ;;  %3200 = vpow2.f32 %v1312_v44  ;;  %v1316_v27 = vmul.f32 1.442695, %v1268_v31  ;;  %v1322_v37 = vmul.f32 1.442695, %v1271_v50 }
 0x31c   :  { %v2458_v8 = vsel %vm1596_vm0, %v3962_v42, %v4127_v43  ;;  %v3181_v41 = vpop.eup %3180  ;;  %3202 = vpow2.f32 %v1314_v59 }
 0x31d   :  { %2491 = vst.msk [vmem:[%s4497_s15 + $0xc0] sm:$0xff] %vm2466_vm1, %v2458_v8  ;;  %1420 = vrot.lane.b32.xlu0 %v3171_v18, %s3391_s21  ;;  %v1215_v58 = vadd.f32 %v1179_v32, %v959_v11  ;;  %v1175_v35 = vmul.f32 0.6931472, %v3181_v41  ;;  %v962_v18 = vmax.f32 %v4002_v24, 0.0  ;;  %3204 = vpow2.f32 %v1318_v51 }
 0x31e   :  { %3206 = vpow2.f32 %v1316_v27  ;;  %v1272_v11 = vmul.f32 0.5, %v4077_v54  ;;  %v1275_v27 = vmul.f32 0.5, %v4090_v63 }
 0x31f   :  { %1426 = vrot.lane.b32.xlu1 %v3175_v26, %s3391_s21  ;;  %v3183_v10 = vpop.eup %3182  ;;  %v4143_v47 = vadd.f32 0.0001, %v1215_v58  ;;  %v1213_v1 = vadd.f32 %v1175_v35, %v957_v49  ;;  %v963_v26 = vmax.f32 %v4022_v16, 0.0  ;;  %v1320_v58 = vmul.f32 1.442695, %v1270_v53 }
 0x320   :  { %v3185_v20 = vpop.eup %3184  ;;  %v1185_v22 = vmul.f32 0.6931472, %v3183_v10  ;;  %3208 = vpow2.f32 %v1322_v37  ;;  %v1324_v53 = vmul.f32 1.442695, %v1272_v11 }
 0x321   :  { %1424 = vrot.lane.b32.xlu0 %v3169_v12, %s3391_s21  ;;  %v3187_v28 = vpop.eup %3186  ;;  %v2461_v39 = vsel %vm1596_vm0, %v3967_v9, %v4143_v47  ;;  %v1245_v59 = vadd.f32 0.0001, %v1213_v1  ;;  %3210 = vpow2.f32 %v1320_v58 }
 0x322   :  { %v3189_v56 = vpop.eup %3188  ;;  %2494 = vst.msk [vmem:[%s4497_s15 + $0xd8] sm:$0xff] %vm2466_vm1, %v2461_v39  ;;  %v1218_v12 = vadd.f32 %v1185_v22, %v962_v18  ;;  %v1181_v44 = vmul.f32 0.6931472, %v3187_v28  ;;  %v1274_v39 = vmul.f32 0.5, %v4062_v25 }
 0x323   :  { %1430 = vrot.lane.b32.xlu1 %v3179_v33, %s3391_s21  ;;  %v1187_v38 = vmul.f32 0.6931472, %v3189_v56  ;;  %v3191_v8 = vpop.eup %3190  ;;  %v2459_v41 = vsel %vm1596_vm0, %v3994_v62, %v1245_v59  ;;  %v1326_v33 = vmul.f32 1.442695, %v1273_v60  ;;  %v1277_v63 = vmul.f32 0.5, %v1245_v59 }
 0x324   :  { %v4161_v32 = vadd.f32 0.0001, %v1218_v12  ;;  %v1216_v31 = vadd.f32 %v1181_v44, %v960_v36  ;;  %v3193_v17 = vpop.eup %3192  ;;  %2492 = vst.msk [vmem:[%s4497_s15 + $0xc8] sm:$0xff] %vm2466_vm1, %v2459_v41  ;;  %v1330_v56 = vmul.f32 1.442695, %v1275_v27  ;;  %v1276_v60 = vmul.f32 0.5, %v4127_v43 }
 0x325   :  { %1428 = vrot.lane.b32.xlu0 %v3185_v20, %s3391_s21  ;;  %v1219_v51 = vadd.f32 %v1187_v38, %v963_v26  ;;  %v3195_v10 = vpop.eup %3194  ;;  %v961_v20 = vmax.f32 %v4026_v45, 0.0  ;;  %3212 = vpow2.f32 %v1326_v33  ;;  %v1328_v44 = vmul.f32 1.442695, %v1274_v39 }
 0x326   :  { %v2464_v54 = vsel %vm1596_vm0, %v4002_v24, %v4161_v32  ;;  %v1248_v50 = vadd.f32 0.0001, %v1216_v31  ;;  %v3197_v49 = vpop.eup %3196  ;;  %3214 = vpow2.f32 %v1324_v53  ;;  %v1334_v37 = vmul.f32 1.442695, %v1277_v63  ;;  %v3028_v63 = vld [vmem:[#allocation5 + $0x38] sm:$0xff]  }
 0x327   :  { %1434 = vrot.lane.b32.xlu1 %v3193_v17, %s3391_s21  ;;  %2497 = vst.msk [vmem:[%s4497_s15 + $0xf0] sm:$0xff] %vm2466_vm1, %v2464_v54  ;;  %v1251_v35 = vadd.f32 0.0001, %v1219_v51  ;;  %v1183_v22 = vmul.f32 0.6931472, %v3197_v49  ;;  %v3199_v28 = vpop.eup %3198  ;;  %3216 = vpow2.f32 %v1330_v56  ;;  %v1279_v43 = vmul.f32 0.5, %v4143_v47  ;;  %2898 = vmatprep.subr.bf16.mxu0 %v3028_v63 }
 0x328   :  { %v2462_v18 = vsel %vm1596_vm0, %v4019_v40, %v1248_v50  ;;  %v3201_v36 = vpop.eup %3200  ;;  %3218 = vpow2.f32 %v1328_v44  ;;  %v1278_v31 = vmul.f32 0.5, %v4094_v14  ;;  %v1280_v51 = vmul.f32 0.5, %v1248_v50  ;;  %2899 = vmatpush3.bf16.msra.mxu0 %v3028_v63  ;;  %v3030_v56 = vld [vmem:[#allocation5 + $0x28] sm:$0xff]   ;;  %v3032_v44 = vld [vmem:[#allocation5 + $0x18] sm:$0xff]  }
 0x329   :  { %1432 = vrot.lane.b32.xlu0 %v3191_v8, %s3391_s21  ;;  %2495 = vst.msk [vmem:[%s4497_s15 + $0xe0] sm:$0xff] %vm2466_vm1, %v2462_v18  ;;  %v2465_v1 = vsel %vm1596_vm0, %v4022_v16, %v1251_v35  ;;  %v1217_v26 = vadd.f32 %v1183_v22, %v961_v20  ;;  %v3203_v25 = vpop.eup %3202  ;;  %v1332_v8 = vmul.f32 1.442695, %v1276_v60  ;;  %3220 = vpow2.f32 %v1334_v37  ;;  %v3033_v37 = vld [vmem:[#allocation5 + $0x10] sm:$0xff]  }
 0x32a   :  { %2498 = vst.msk [vmem:[%s4497_s15 + $0xf8] sm:$0xff] %vm2466_vm1, %v2465_v1  ;;  %v3205_v38 = vpop.eup %3204  ;;  %v1338_v41 = vmul.f32 1.442695, %v1279_v43  ;;  %v1340_v49 = vmul.f32 1.442695, %v1280_v51  ;;  %v1283_v20 = vmul.f32 0.5, %v1251_v35 }
 0x32b   :  { %1438 = vrot.lane.b32.xlu1 %v3195_v10, %s3391_s21  ;;  %v1249_v12 = vadd.f32 0.0001, %v1217_v26  ;;  %v3207_v11 = vpop.eup %3206  ;;  %3222 = vpow2.f32 %v1332_v8  ;;  %v1336_v10 = vmul.f32 1.442695, %v1278_v31  ;;  %v1282_v53 = vmul.f32 0.5, %v4161_v32  ;;  %v3029_v26 = vld [vmem:[#allocation5 + $0x30] sm:$0xff]  }
 0x32c   :  { %3224 = vpow2.f32 %v1338_v41  ;;  %v1346_v50 = vmul.f32 1.442695, %v1283_v20  ;;  %2900 = vmatprep.subr.bf16.mxu0 %v3029_v26  ;;  %v1351_v43 = vld [vmem:[%s4483_s1 + $0x18] sm:$0xff] }
 0x32d   :  { %1436 = vrot.lane.b32.xlu0 %v3199_v28, %s3391_s21  ;;  %v2463_v59 = vsel %vm1596_vm0, %v4026_v45, %v1249_v12  ;;  %v1281_v17 = vmul.f32 0.5, %v1249_v12  ;;  %v3209_v58 = vpop.eup %3208  ;;  %3226 = vpow2.f32 %v1336_v10  ;;  %v1344_v22 = vmul.f32 1.442695, %v1282_v53  ;;  %2901 = vmatpush3.bf16.msra.mxu0 %v3029_v26  ;;  %v3031_v12 = vld [vmem:[#allocation5 + $0x20] sm:$0xff]  }
 0x32e   :  { %2496 = vst.msk [vmem:[%s4497_s15 + $0xe8] sm:$0xff] %vm2466_vm1, %v2463_v59  ;;  %v3211_v33 = vpop.eup %3210  ;;  %2902 = vmatprep.subr.bf16.mxu0 %v3030_v56 }
 0x32f   :  { %1442 = vrot.lane.b32.xlu1 %v3203_v25, %s3391_s21  ;;  %v1342_v54 = vmul.f32 1.442695, %v1281_v17  ;;  %v1349_v17 = vld [vmem:[%s4483_s1 + $0x8] sm:$0xff] }
 0x331   :  { %1440 = vrot.lane.b32.xlu0 %v3201_v36, %s3391_s21  ;;  %3228 = vpow2.f32 %v1342_v54  ;;  %2903 = vmatpush3.bf16.msra.mxu0 %v3030_v56 }
 0x332   :  { %v3213_v47 = vpop.eup %3212  ;;  %3230 = vpow2.f32 %v1340_v49  ;;  %2904 = vmatprep.subr.bf16.mxu0 %v3031_v12  ;;  %v1352_v49 = vld [vmem:[%s4483_s1 + $0x20] sm:$0xff] }
 0x333   :  { %1446 = vrot.lane.b32.xlu1 %v3205_v38, %s3391_s21  ;;  %v3215_v14 = vpop.eup %3214  ;;  %3232 = vpow2.f32 %v1346_v50  ;;  %v1348_v38 = vld [vmem:[%s4483_s1] sm:$0xff] }
 0x334   :  { %v3217_v27 = vpop.eup %3216  ;;  %3234 = vpow2.f32 %v1344_v22  ;;  %v1355_v22 = vld [vmem:[%s4483_s1 + $0x38] sm:$0xff] }
 0x335   :  { %1444 = vrot.lane.b32.xlu0 %v3207_v11, %s3391_s21  ;;  %v3219_v18 = vpop.eup %3218  ;;  %2905 = vmatpush3.bf16.msra.mxu0 %v3031_v12  ;;  %v1350_v11 = vld [vmem:[%s4483_s1 + $0x10] sm:$0xff] }
 0x336   :  { %v3221_v28 = vpop.eup %3220  ;;  %2906 = vmatprep.subr.bf16.mxu0 %v3032_v44 }
 0x337   :  { %1450 = vrot.lane.b32.xlu1 %v3209_v58, %s3391_s21 }
 0x338   :  { %v3223_v35 = vpop.eup %3222 }
 0x339   :  { %1448 = vrot.lane.b32.xlu0 %v3211_v33, %s3391_s21  ;;  %v3225_v32 = vpop.eup %3224  ;;  %2907 = vmatpush3.bf16.msra.mxu0 %v3032_v44  ;;  %v1353_v33 = vld [vmem:[%s4483_s1 + $0x28] sm:$0xff]  ;;  %v1359_v44 = vld [vmem:[%s4483_s1 + $0x58] sm:$0xff] }
 0x33a   :  { %v3227_v39 = vpop.eup %3226  ;;  %2908 = vmatprep.subr.bf16.mxu0 %v3033_v37 }
 0x33b   :  { %1454 = vrot.lane.b32.xlu1 %v3213_v47, %s3391_s21 }
 0x33d   :  { %1452 = vrot.lane.b32.xlu0 %v3215_v14, %s3391_s21  ;;  %2909 = vmatpush3.bf16.msra.mxu0 %v3033_v37 }
 0x33e   :  { %v3229_v1 = vpop.eup %3228 }
 0x33f   :  { %1458 = vrot.lane.b32.xlu1 %v3217_v27, %s3391_s21  ;;  %v3231_v36 = vpop.eup %3230 }
 0x340   :  { %v3233_v25 = vpop.eup %3232 }
 0x341   :  { %1456 = vrot.lane.b32.xlu0 %v3219_v18, %s3391_s21  ;;  %v3235_v60 = vpop.eup %3234 }
 0x343   :  { %1462 = vrot.lane.b32.xlu1 %v3221_v28, %s3391_s21 }
 0x345   :  { %1460 = vrot.lane.b32.xlu0 %v3223_v35, %s3391_s21 }
 0x347   :  { %1466 = vrot.lane.b32.xlu1 %v3225_v32, %s3391_s21 }
 0x349   :  { %1464 = vrot.lane.b32.xlu0 %v3227_v39, %s3391_s21  ;;  %v1354_v39 = vld [vmem:[%s4483_s1 + $0x30] sm:$0xff] }
 0x34b   :  { %1470 = vrot.lane.b32.xlu1 %v3229_v1, %s3391_s21 }
 0x34d   :  { %1468 = vrot.lane.b32.xlu0 %v3231_v36, %s3391_s21  ;;  %v1357_v36 = vld [vmem:[%s4483_s1 + $0x48] sm:$0xff] }
 0x34f   :  { %1474 = vrot.lane.b32.xlu1 %v3233_v25, %s3391_s21  ;;  %v1356_v25 = vld [vmem:[%s4483_s1 + $0x40] sm:$0xff] }
 0x351   :  { %1472 = vrot.lane.b32.xlu0 %v3235_v60, %s3391_s21 }
 0x385   :  { %v1417_v59 = vpop.permute.xlu1 %1416 }
 0x386   :  { %v1510_v51 = vmul.f32 %v1417_v59, %v1350_v11 }
 0x387   :  { %v1413_v8 = vpop.permute.xlu0 %1412 }
 0x388   :  { %v1508_v58 = vmul.f32 %v1413_v8, %v1348_v38  ;;  %v1542_v27 = vadd.f32 %v1510_v51, %v3708_v46 }
 0x389   :  { %v1419_v31 = vpop.permute.xlu1 %1418 }
 0x38a   :  { %v1511_v41 = vmul.f32 %v1419_v31, %v1351_v43  ;;  %v1540_v14 = vadd.f32 %v1508_v58, %v3712_v48  ;;  %v1361_v31 = vld [vmem:[%s4483_s1 + $0x68] sm:$0xff] }
 0x38b   :  { %v1415_v10 = vpop.permute.xlu0 %1414 }
 0x38c   :  { %v1509_v54 = vmul.f32 %v1415_v10, %v1349_v17  ;;  %v1543_v47 = vadd.f32 %v1511_v41, %v3716_v52 }
 0x38d   :  { %v1423_v20 = vpop.permute.xlu1 %1422 }
 0x38e   :  { %v1541_v53 = vadd.f32 %v1509_v54, %v3720_v57  ;;  %v1513_v50 = vmul.f32 %v1423_v20, %v1353_v33  ;;  %v1573_v32 = vpack.c.bf16 %v1543_v47, %v1542_v27  ;;  %v1363_v54 = vld [vmem:[%s4483_s1 + $0x78] sm:$0xff] }
 0x38f   :  { %v1421_v18 = vpop.permute.xlu0 %1420 }
 0x390   :  { %v1572_v28 = vpack.c.bf16 %v1541_v53, %v1540_v14  ;;  %v1512_v35 = vmul.f32 %v1421_v18, %v1352_v49  ;;  %v1545_v52 = vadd.f32 %v1513_v50, %v3736_v13  ;;  %v4506_v53 = vld [vmem:[#allocation13_spill] sm:$0xff] }
 0x391   :  { %v1427_v48 = vpop.permute.xlu1 %1426  ;;  %v1365_v18 = vld [vmem:[%s4483_s1 + $0x88] sm:$0xff] }
 0x392   :  { %v1544_v57 = vadd.f32 %v1512_v35, %v3728_v3  ;;  %2866 = vmatprep.mubr.msk.bf16.mxu1 %vm1596_vm0, %v1572_v28  ;;  %v1515_v46 = vmul.f32 %v1427_v48, %v1355_v22  ;;  %v4507_v35 = vld [vmem:[#allocation14_spill] sm:$0xff] }
 0x393   :  { %2867 = vmatmul.mubr.msk.bf16.vlgmr.msra.gmra.mxu1 %vm1596_vm0, %v1573_v32  ;;  %v1425_v1 = vpop.permute.xlu0 %1424 }
 0x394   :  { %v1574_v63 = vpack.c.bf16 %v1545_v52, %v1544_v57  ;;  %v1514_v13 = vmul.f32 %v1425_v1, %v1354_v39  ;;  %v1547_v26 = vadd.f32 %v1515_v46, %v3731_v6  ;;  %v1358_v6 = vld [vmem:[%s4483_s1 + $0x50] sm:$0xff]  ;;  %v4508_v39 = vld [vmem:[#allocation12_spill] sm:$0xff]  ;;  %v1367_v1 = vld [vmem:[%s4483_s1 + $0x98] sm:$0xff] }
 0x395   :  { %v1431_v56 = vpop.permute.xlu1 %1430 }
 0x396   :  { %v1546_v3 = vadd.f32 %v1514_v13, %v3723_v61  ;;  %2870 = vmatprep.mubr.msk.bf16.mxu1 %vm1596_vm0, %v1574_v63  ;;  %v1517_v60 = vmul.f32 %v1431_v56, %v1357_v36 }
 0x397   :  { %v1429_v12 = vpop.permute.xlu0 %1428 }
 0x398   :  { %v1575_v37 = vpack.c.bf16 %v1547_v26, %v1546_v3  ;;  %v1516_v59 = vmul.f32 %v1429_v12, %v1356_v25  ;;  %v1549_v38 = vadd.f32 %v1517_v60, %v3751_v34  ;;  %v1360_v34 = vld [vmem:[%s4483_s1 + $0x60] sm:$0xff]  ;;  %v1366_v26 = vld [vmem:[%s4483_s1 + $0x90] sm:$0xff]  ;;  %v1369_v12 = vld [vmem:[%s4483_s1 + $0xa8] sm:$0xff] }
 0x399   :  { %v1435_v8 = vpop.permute.xlu1 %1434 }
 0x39a   :  { %v1548_v43 = vadd.f32 %v1516_v59, %v3743_v23  ;;  %v1519_v61 = vmul.f32 %v1435_v8, %v1359_v44 }
 0x39b   :  { %v1433_v11 = vpop.permute.xlu0 %1432  ;;  %2871 = vmatmul.mubr.msk.bf16.gmra.mxu1 %vm1596_vm0, %v1575_v37 }
 0x39c   :  { %v1576_v17 = vpack.c.bf16 %v1549_v38, %v1548_v43  ;;  %v1518_v58 = vmul.f32 %v1433_v11, %v1358_v6  ;;  %v1551_v41 = vadd.f32 %v1519_v61, %v3748_v30  ;;  %v1362_v30 = vld [vmem:[%s4483_s1 + $0x70] sm:$0xff]  ;;  %v4509_v6 = vld [vmem:[#allocation15_spill] sm:$0xff] }
 0x39d   :  { %v1439_v51 = vpop.permute.xlu1 %1438  ;;  %v1371_v61 = vld [vmem:[%s4483_s1 + $0xb8] sm:$0xff] }
 0x39e   :  { %v1550_v10 = vadd.f32 %v1518_v58, %v3740_v19  ;;  %2874 = vmatprep.mubr.msk.bf16.mxu1 %vm1596_vm0, %v1576_v17  ;;  %v1521_v23 = vmul.f32 %v1439_v51, %v1361_v31 }
 0x39f   :  { %v1437_v33 = vpop.permute.xlu0 %1436 }
 0x3a0   :  { %v1577_v47 = vpack.c.bf16 %v1551_v41, %v1550_v10  ;;  %v1520_v49 = vmul.f32 %v1437_v33, %v1360_v34  ;;  %v1553_v20 = vadd.f32 %v1521_v23, %v3767_v4  ;;  %v1364_v4 = vld [vmem:[%s4483_s1 + $0x80] sm:$0xff]  ;;  %v1373_v10 = vld [vmem:[%s4483_s1 + $0xc8] sm:$0xff] }
 0x3a1   :  { %v1443_v14 = vpop.permute.xlu1 %1442 }
 0x3a2   :  { %v1552_v50 = vadd.f32 %v1520_v49, %v4506_v53  ;;  %v1523_v19 = vmul.f32 %v1443_v14, %v1363_v54 }
 0x3a3   :  { %v1441_v27 = vpop.permute.xlu0 %1440  ;;  %2875 = vmatmul.mubr.msk.bf16.gmra.mxu1 %vm1596_vm0, %v1577_v47 }
 0x3a4   :  { %v1578_v22 = vpack.c.bf16 %v1553_v20, %v1552_v50  ;;  %v1522_v28 = vmul.f32 %v1441_v27, %v1362_v30  ;;  %v1555_v52 = vadd.f32 %v1523_v19, %v4507_v35  ;;  %v1375_v30 = vld [vmem:[%s4483_s1 + $0xd8] sm:$0xff] }
 0x3a5   :  { %v1447_v32 = vpop.permute.xlu1 %1446 }
 0x3a6   :  { %v1554_v48 = vadd.f32 %v1522_v28, %v4508_v39  ;;  %2878 = vmatprep.mubr.msk.bf16.mxu1 %vm1596_vm0, %v1578_v22  ;;  %v1525_v57 = vmul.f32 %v1447_v32, %v1365_v18  ;;  %v1377_v22 = vld [vmem:[%s4483_s1 + $0xe8] sm:$0xff] }
 0x3a7   :  { %v1445_v46 = vpop.permute.xlu0 %1444 }
 0x3a8   :  { %v1579_v36 = vpack.c.bf16 %v1555_v52, %v1554_v48  ;;  %v1524_v63 = vmul.f32 %v1445_v46, %v1364_v4  ;;  %v1557_v13 = vadd.f32 %v1525_v57, %v3850_v7  ;;  %v1368_v7 = vld [vmem:[%s4483_s1 + $0xa0] sm:$0xff]  ;;  %v1379_v48 = vld [vmem:[%s4483_s1 + $0xf8] sm:$0xff] }
 0x3a9   :  { %v1451_v25 = vpop.permute.xlu1 %1450 }
 0x3aa   :  { %v1556_v56 = vadd.f32 %v1524_v63, %v3775_v21  ;;  %v1527_v3 = vmul.f32 %v1451_v25, %v1367_v1 }
 0x3ab   :  { %v1449_v60 = vpop.permute.xlu0 %1448  ;;  %2879 = vmatmul.mubr.msk.bf16.gmra.mxu1 %vm1596_vm0, %v1579_v36 }
 0x3ac   :  { %v1580_v44 = vpack.c.bf16 %v1557_v13, %v1556_v56  ;;  %v1526_v37 = vmul.f32 %v1449_v60, %v1366_v26  ;;  %v1559_v59 = vadd.f32 %v1527_v3, %v3844_v0  ;;  %v1370_v0 = vld [vmem:[%s4483_s1 + $0xb0] sm:$0xff]  ;;  %v3034_v60 = vld [vmem:[#allocation5 + $0x8] sm:$0xff]  }
 0x3ad   :  { %v1455_v38 = vpop.permute.xlu1 %1454  ;;  %2910 = vmatprep.subr.bf16.mxu0 %v3034_v60 }
 0x3ae   :  { %v1558_v8 = vadd.f32 %v1526_v37, %v4509_v6  ;;  %2882 = vmatprep.mubr.msk.bf16.mxu1 %vm1596_vm0, %v1580_v44  ;;  %v1529_v21 = vmul.f32 %v1455_v38, %v1369_v12  ;;  %2911 = vmatpush3.bf16.msra.mxu0 %v3034_v60  ;;  %v3035_v12 = vld [vmem:[#allocation5] sm:$0xff]   ;;  %v3037_v44 = vld [vmem:[#allocation7 + $0x30] sm:$0xff]   ;;  %v3038_v37 = vld [vmem:[#allocation7 + $0x28] sm:$0xff]  }
 0x3af   :  { %v1453_v43 = vpop.permute.xlu0 %1452  ;;  %2912 = vmatprep.subr.bf16.mxu0 %v3035_v12  ;;  %v4371_v6 = vld [vmem:[%s4491_s9] ss:$0 sm:$0xff] }
 0x3b0   :  { %v1581_v11 = vpack.c.bf16 %v1559_v59, %v1558_v8  ;;  %v1528_v31 = vmul.f32 %v1453_v43, %v1368_v7  ;;  %v1561_v17 = vadd.f32 %v1529_v21, %v3944_v2  ;;  %v1372_v2 = vld [vmem:[%s4483_s1 + $0xc0] sm:$0xff]  ;;  %v3041_v59 = vld [vmem:[#allocation7 + $0x10] sm:$0xff]  }
 0x3b1   :  { %v1459_v58 = vpop.permute.xlu1 %1458 }
 0x3b2   :  { %v1560_v41 = vadd.f32 %v1528_v31, %v3918_v29  ;;  %v1531_v34 = vmul.f32 %v1459_v58, %v1371_v61  ;;  %2913 = vmatpush3.bf16.msra.mxu0 %v3035_v12 }
 0x3b3   :  { %v1457_v51 = vpop.permute.xlu0 %1456  ;;  %2883 = vmatmul.mubr.msk.bf16.gmra.mxu1 %vm1596_vm0, %v1581_v11 }
 0x3b4   :  { %v1582_v23 = vpack.c.bf16 %v1561_v17, %v1560_v41  ;;  %v1530_v33 = vmul.f32 %v1457_v51, %v1370_v0  ;;  %v1563_v54 = vadd.f32 %v1531_v34, %v3941_v55  ;;  %v1374_v55 = vld [vmem:[%s4483_s1 + $0xd0] sm:$0xff] }
 0x3b5   :  { %v1463_v47 = vpop.permute.xlu1 %1462 }
 0x3b6   :  { %v1562_v49 = vadd.f32 %v1530_v33, %v3903_v15  ;;  %2886 = vmatprep.mubr.msk.bf16.mxu1 %vm1596_vm0, %v1582_v23  ;;  %v1533_v29 = vmul.f32 %v1463_v47, %v1373_v10 }
 0x3b7   :  { %v1461_v20 = vpop.permute.xlu0 %1460 }
 0x3b8   :  { %v1583_v14 = vpack.c.bf16 %v1563_v54, %v1562_v49  ;;  %v1532_v53 = vmul.f32 %v1461_v20, %v1372_v2  ;;  %v1565_v50 = vadd.f32 %v1533_v29, %v3994_v62  ;;  %v1376_v62 = vld [vmem:[%s4483_s1 + $0xe0] sm:$0xff] }
 0x3b9   :  { %v1467_v19 = vpop.permute.xlu1 %1466 }
 0x3ba   :  { %v1564_v27 = vadd.f32 %v1532_v53, %v3962_v42  ;;  %v1535_v15 = vmul.f32 %v1467_v19, %v1375_v30 }
 0x3bb   :  { %v1465_v18 = vpop.permute.xlu0 %1464  ;;  %2887 = vmatmul.mubr.msk.bf16.gmra.mxu1 %vm1596_vm0, %v1583_v14 }
 0x3bc   :  { %v1584_v28 = vpack.c.bf16 %v1565_v50, %v1564_v27  ;;  %v1534_v35 = vmul.f32 %v1465_v18, %v1374_v55  ;;  %v1567_v52 = vadd.f32 %v1535_v15, %v3967_v9  ;;  %v1378_v9 = vld [vmem:[%s4483_s1 + $0xf0] sm:$0xff] }
 0x3bd   :  { %v1471_v4 = vpop.permute.xlu1 %1470 }
 0x3be   :  { %v1566_v32 = vadd.f32 %v1534_v35, %v3947_v5  ;;  %2890 = vmatprep.mubr.msk.bf16.mxu1 %vm1596_vm0, %v1584_v28  ;;  %v1537_v42 = vmul.f32 %v1471_v4, %v1377_v22 }
 0x3bf   :  { %v1469_v39 = vpop.permute.xlu0 %1468 }
 0x3c0   :  { %v1585_v57 = vpack.c.bf16 %v1567_v52, %v1566_v32  ;;  %v1536_v46 = vmul.f32 %v1469_v39, %v1376_v62  ;;  %v1569_v1 = vadd.f32 %v1537_v42, %v4026_v45 }
 0x3c1   :  { %v1475_v36 = vpop.permute.xlu1 %1474 }
 0x3c2   :  { %v1568_v63 = vadd.f32 %v1536_v46, %v4019_v40  ;;  %v1539_v5 = vmul.f32 %v1475_v36, %v1379_v48  ;;  %v3036_v40 = vld [vmem:[#allocation7 + $0x38] sm:$0xff]  }
 0x3c3   :  { %v1473_v13 = vpop.permute.xlu0 %1472  ;;  %2891 = vmatmul.mubr.msk.bf16.gmra.mxu1 %vm1596_vm0, %v1585_v57  ;;  %2946 = vmatprep.subr.bf16.mxu1 %v3036_v40 }
 0x3c4   :  { %v1586_v26 = vpack.c.bf16 %v1569_v1, %v1568_v63  ;;  %v1538_v25 = vmul.f32 %v1473_v13, %v1378_v9  ;;  %v1571_v56 = vadd.f32 %v1539_v5, %v4022_v16  ;;  %2947 = vmatpush3.bf16.msra.mxu1 %v3036_v40  ;;  %v3040_v16 = vld [vmem:[#allocation7 + $0x18] sm:$0xff]  }
 0x3c5   :  { %2948 = vmatprep.subr.bf16.mxu1 %v3037_v44 }
 0x3c6   :  { %v1570_v3 = vadd.f32 %v1538_v25, %v4002_v24  ;;  %2894 = vmatprep.mubr.msk.bf16.mxu1 %vm1596_vm0, %v1586_v26  ;;  %v3039_v24 = vld [vmem:[#allocation7 + $0x20] sm:$0xff]  }
 0x3c8   :  { %v1587_v45 = vpack.c.bf16 %v1571_v56, %v1570_v3  ;;  %2949 = vmatpush3.bf16.msra.mxu1 %v3037_v44 }
 0x3c9   :  { %2950 = vmatprep.subr.bf16.mxu1 %v3038_v37 }
 0x3cb   :  { %2895 = vmatmul.mubr.msk.bf16.gmra.mxu1 %vm1596_vm0, %v1587_v45 }
 0x3cc   :  { %2951 = vmatpush3.bf16.msra.mxu1 %v3038_v37 }
 0x3cd   :  { %2952 = vmatprep.subr.bf16.mxu1 %v3039_v24 }
 0x3d0   :  { %2953 = vmatpush3.bf16.msra.mxu1 %v3039_v24 }
 0x3d1   :  { %2954 = vmatprep.subr.bf16.mxu1 %v3040_v16 }
 0x3d4   :  { %2955 = vmatpush3.bf16.msra.mxu1 %v3040_v16 }
 0x3d5   :  { %2956 = vmatprep.subr.bf16.mxu1 %v3041_v59 }
 0x3d8   :  { %2957 = vmatpush3.bf16.msra.mxu1 %v3041_v59 }
 0x453   :  { %v2868_v7 = vpop.f32.mrf.mxu1 }
 0x454   :  { %v1692_v61 = vadd.f32 %v2868_v7, %v4371_v6 }
 0x455   :  { %v1683_v38 = vpop.f32.mrf.mxu1 }
 0x456   :  { %v1684_v21 = vadd.f32 %v4371_v6, %v1683_v38  ;;  %v1812_v34 = vmax.f32 %v1692_v61, 0.0 }
 0x457   :  { %v2869_v8 = vpop.f32.mrf.mxu1 }
 0x458   :  { %v1695_v43 = vadd.f32 %v2869_v8, %v4371_v6  ;;  %v1810_v58 = vmax.f32 %v1684_v21, 0.0 }
 0x459   :  { %v1686_v11 = vpop.f32.mrf.mxu1 }
 0x45a   :  { %v1687_v31 = vadd.f32 %v4371_v6, %v1686_v11  ;;  %v1813_v17 = vmax.f32 %v1695_v43, 0.0 }
 0x45b   :  { %v2872_v0 = vpop.f32.mrf.mxu1 }
 0x45c   :  { %v1811_v41 = vmax.f32 %v1687_v31, 0.0  ;;  %v1843_v23 = vpack.c.bf16 %v1813_v17, %v1812_v34  ;;  %v1708_v47 = vadd.f32 %v2872_v0, %v4371_v6 }
 0x45d   :  { %v1699_v51 = vpop.f32.mrf.mxu1 }
 0x45e   :  { %v1842_v10 = vpack.c.bf16 %v1811_v41, %v1810_v58  ;;  %v1700_v54 = vadd.f32 %v4371_v6, %v1699_v51  ;;  %v1816_v50 = vmax.f32 %v1708_v47, 0.0 }
 0x45f   :  { %v2873_v33 = vpop.f32.mrf.mxu1 }
 0x460   :  { %2914 = vmatprep.mubr.bf16.mxu0 %v1842_v10  ;;  %v1711_v2 = vadd.f32 %v2873_v33, %v4371_v6  ;;  %v1814_v14 = vmax.f32 %v1700_v54, 0.0 }
 0x461   :  { %2915 = vmatmul.mubr.bf16.vlgmr.msra.gmra.mxu0 %v1843_v23  ;;  %v1702_v49 = vpop.f32.mrf.mxu1 }
 0x462   :  { %v1703_v29 = vadd.f32 %v4371_v6, %v1702_v49  ;;  %v1817_v20 = vmax.f32 %v1711_v2, 0.0 }
 0x463   :  { %v2876_v30 = vpop.f32.mrf.mxu1 }
 0x464   :  { %v1815_v53 = vmax.f32 %v1703_v29, 0.0  ;;  %v1845_v27 = vpack.c.bf16 %v1817_v20, %v1816_v50  ;;  %v1724_v28 = vadd.f32 %v2876_v30, %v4371_v6 }
 0x465   :  { %v1715_v55 = vpop.f32.mrf.mxu1 }
 0x466   :  { %v1844_v19 = vpack.c.bf16 %v1815_v53, %v1814_v14  ;;  %v1716_v18 = vadd.f32 %v4371_v6, %v1715_v55  ;;  %v1820_v39 = vmax.f32 %v1724_v28, 0.0 }
 0x467   :  { %v2877_v15 = vpop.f32.mrf.mxu1 }
 0x468   :  { %v1727_v22 = vadd.f32 %v2877_v15, %v4371_v6  ;;  %2918 = vmatprep.mubr.bf16.mxu0 %v1844_v19  ;;  %v1818_v32 = vmax.f32 %v1716_v18, 0.0 }
 0x469   :  { %v1718_v35 = vpop.f32.mrf.mxu1  ;;  %2919 = vmatmul.mubr.bf16.gmra.mxu0 %v1845_v27 }
 0x46a   :  { %v1719_v52 = vadd.f32 %v4371_v6, %v1718_v35  ;;  %v1821_v62 = vmax.f32 %v1727_v22, 0.0 }
 0x46b   :  { %v2880_v4 = vpop.f32.mrf.mxu1 }
 0x46c   :  { %v1819_v42 = vmax.f32 %v1719_v52, 0.0  ;;  %v1847_v46 = vpack.c.bf16 %v1821_v62, %v1820_v39  ;;  %v1740_v63 = vadd.f32 %v2880_v4, %v4371_v6 }
 0x46d   :  { %v1731_v48 = vpop.f32.mrf.mxu1 }
 0x46e   :  { %v1846_v57 = vpack.c.bf16 %v1819_v42, %v1818_v32  ;;  %v1732_v9 = vadd.f32 %v4371_v6, %v1731_v48  ;;  %v1824_v45 = vmax.f32 %v1740_v63, 0.0 }
 0x46f   :  { %v2881_v1 = vpop.f32.mrf.mxu1 }
 0x470   :  { %v1743_v36 = vadd.f32 %v2881_v1, %v4371_v6  ;;  %2922 = vmatprep.mubr.bf16.mxu0 %v1846_v57  ;;  %v1822_v56 = vmax.f32 %v1732_v9, 0.0 }
 0x471   :  { %v1734_v5 = vpop.f32.mrf.mxu1  ;;  %2923 = vmatmul.mubr.bf16.gmra.mxu0 %v1847_v46 }
 0x472   :  { %v1735_v13 = vadd.f32 %v4371_v6, %v1734_v5  ;;  %v1825_v26 = vmax.f32 %v1743_v36, 0.0 }
 0x473   :  { %v2884_v25 = vpop.f32.mrf.mxu1 }
 0x474   :  { %v1823_v3 = vmax.f32 %v1735_v13, 0.0  ;;  %v1849_v40 = vpack.c.bf16 %v1825_v26, %v1824_v45  ;;  %v1756_v16 = vadd.f32 %v2884_v25, %v4371_v6  ;;  %v3042_v13 = vld [vmem:[#allocation7 + $0x8] sm:$0xff]   ;;  %v3043_v26 = vld [vmem:[#allocation7] sm:$0xff]  }
 0x475   :  { %v1747_v60 = vpop.f32.mrf.mxu1  ;;  %2958 = vmatprep.subr.bf16.mxu1 %v3042_v13 }
 0x476   :  { %v1848_v12 = vpack.c.bf16 %v1823_v3, %v1822_v56  ;;  %v1748_v37 = vadd.f32 %v4371_v6, %v1747_v60  ;;  %v1828_v61 = vmax.f32 %v1756_v16, 0.0  ;;  %2959 = vmatpush3.bf16.msra.mxu1 %v3042_v13 }
 0x477   :  { %v2885_v44 = vpop.f32.mrf.mxu1  ;;  %2960 = vmatprep.subr.bf16.mxu1 %v3043_v26 }
 0x478   :  { %v1759_v24 = vadd.f32 %v2885_v44, %v4371_v6  ;;  %2926 = vmatprep.mubr.bf16.mxu0 %v1848_v12  ;;  %v1826_v21 = vmax.f32 %v1748_v37, 0.0 }
 0x479   :  { %v1750_v59 = vpop.f32.mrf.mxu1  ;;  %2927 = vmatmul.mubr.bf16.gmra.mxu0 %v1849_v40 }
 0x47a   :  { %v1751_v7 = vadd.f32 %v4371_v6, %v1750_v59  ;;  %v1829_v38 = vmax.f32 %v1759_v24, 0.0  ;;  %2961 = vmatpush3.bf16.msra.mxu1 %v3043_v26 }
 0x47b   :  { %v2888_v8 = vpop.f32.mrf.mxu1 }
 0x47c   :  { %v1827_v43 = vmax.f32 %v1751_v7, 0.0  ;;  %v1851_v17 = vpack.c.bf16 %v1829_v38, %v1828_v61  ;;  %v1772_v34 = vadd.f32 %v2888_v8, %v4371_v6 }
 0x47d   :  { %v1763_v11 = vpop.f32.mrf.mxu1 }
 0x47e   :  { %v1850_v31 = vpack.c.bf16 %v1827_v43, %v1826_v21  ;;  %v1764_v58 = vadd.f32 %v4371_v6, %v1763_v11  ;;  %v1832_v47 = vmax.f32 %v1772_v34, 0.0 }
 0x47f   :  { %v2889_v0 = vpop.f32.mrf.mxu1 }
 0x480   :  { %v1775_v41 = vadd.f32 %v2889_v0, %v4371_v6  ;;  %2930 = vmatprep.mubr.bf16.mxu0 %v1850_v31  ;;  %v1830_v54 = vmax.f32 %v1764_v58, 0.0 }
 0x481   :  { %v1766_v51 = vpop.f32.mrf.mxu1  ;;  %2931 = vmatmul.mubr.bf16.gmra.mxu0 %v1851_v17 }
 0x482   :  { %v1767_v10 = vadd.f32 %v4371_v6, %v1766_v51  ;;  %v1833_v23 = vmax.f32 %v1775_v41, 0.0 }
 0x483   :  { %v2892_v33 = vpop.f32.mrf.mxu1 }
 0x484   :  { %v1831_v2 = vmax.f32 %v1767_v10, 0.0  ;;  %v1853_v20 = vpack.c.bf16 %v1833_v23, %v1832_v47  ;;  %v1788_v50 = vadd.f32 %v2892_v33, %v4371_v6 }
 0x485   :  { %v1779_v49 = vpop.f32.mrf.mxu1 }
 0x486   :  { %v1852_v29 = vpack.c.bf16 %v1831_v2, %v1830_v54  ;;  %v1780_v14 = vadd.f32 %v4371_v6, %v1779_v49  ;;  %v1836_v28 = vmax.f32 %v1788_v50, 0.0 }
 0x487   :  { %v2893_v30 = vpop.f32.mrf.mxu1 }
 0x488   :  { %v1791_v53 = vadd.f32 %v2893_v30, %v4371_v6  ;;  %2934 = vmatprep.mubr.bf16.mxu0 %v1852_v29  ;;  %v1834_v18 = vmax.f32 %v1780_v14, 0.0 }
 0x489   :  { %v1782_v55 = vpop.f32.mrf.mxu1  ;;  %2935 = vmatmul.mubr.bf16.gmra.mxu0 %v1853_v20 }
 0x48a   :  { %v1783_v19 = vadd.f32 %v4371_v6, %v1782_v55  ;;  %v1837_v27 = vmax.f32 %v1791_v53, 0.0 }
 0x48b   :  { %v2896_v15 = vpop.f32.mrf.mxu1 }
 0x48c   :  { %v1835_v22 = vmax.f32 %v1783_v19, 0.0  ;;  %v1855_v62 = vpack.c.bf16 %v1837_v27, %v1836_v28  ;;  %v1804_v39 = vadd.f32 %v2896_v15, %v4371_v6 }
 0x48d   :  { %v1795_v35 = vpop.f32.mrf.mxu1 }
 0x48e   :  { %v1854_v52 = vpack.c.bf16 %v1835_v22, %v1834_v18  ;;  %v1796_v32 = vadd.f32 %v4371_v6, %v1795_v35  ;;  %v1840_v36 = vmax.f32 %v1804_v39, 0.0 }
 0x48f   :  { %v2897_v4 = vpop.f32.mrf.mxu1 }
 0x490   :  { %v1807_v42 = vadd.f32 %v2897_v4, %v4371_v6  ;;  %2938 = vmatprep.mubr.bf16.mxu0 %v1854_v52  ;;  %v1838_v1 = vmax.f32 %v1796_v32, 0.0 }
 0x491   :  { %v1798_v48 = vpop.f32.mrf.mxu1  ;;  %2939 = vmatmul.mubr.bf16.gmra.mxu0 %v1855_v62 }
 0x492   :  { %v1799_v57 = vadd.f32 %v4371_v6, %v1798_v48  ;;  %v1841_v46 = vmax.f32 %v1807_v42, 0.0  ;;  %v4408_v6 = vld [vmem:[%s4493_s11] ss:$0 sm:$0xff] }
 0x494   :  { %v1839_v9 = vmax.f32 %v1799_v57, 0.0  ;;  %v1857_v5 = vpack.c.bf16 %v1841_v46, %v1840_v36 }
 0x496   :  { %v1856_v63 = vpack.c.bf16 %v1839_v9, %v1838_v1 }
 0x498   :  { %2942 = vmatprep.mubr.bf16.mxu0 %v1856_v63 }
 0x499   :  { %2943 = vmatmul.mubr.bf16.gmra.mxu0 %v1857_v5 }
 0x521   :  { %v2916_v25 = vpop.f32.mrf.mxu0 }
 0x522   :  { %v1972_v12 = vadd.f32 %v2916_v25, %v4408_v6 }
 0x523   :  { %v1963_v56 = vpop.f32.mrf.mxu0 }
 0x524   :  { %v1964_v45 = vadd.f32 %v4408_v6, %v1963_v56  ;;  %v2092_v7 = vmax.f32 %v1972_v12, 0.0 }
 0x525   :  { %v2917_v3 = vpop.f32.mrf.mxu0 }
 0x526   :  { %v1975_v60 = vadd.f32 %v2917_v3, %v4408_v6  ;;  %v2090_v16 = vmax.f32 %v1964_v45, 0.0 }
 0x527   :  { %v1966_v40 = vpop.f32.mrf.mxu0 }
 0x528   :  { %v1967_v44 = vadd.f32 %v4408_v6, %v1966_v40  ;;  %v2093_v37 = vmax.f32 %v1975_v60, 0.0 }
 0x529   :  { %v2920_v24 = vpop.f32.mrf.mxu0 }
 0x52a   :  { %v2091_v59 = vmax.f32 %v1967_v44, 0.0  ;;  %v2123_v21 = vpack.c.bf16 %v2093_v37, %v2092_v7  ;;  %v1988_v31 = vadd.f32 %v2920_v24, %v4408_v6 }
 0x52b   :  { %v1979_v38 = vpop.f32.mrf.mxu0 }
 0x52c   :  { %v2122_v8 = vpack.c.bf16 %v2091_v59, %v2090_v16  ;;  %v1980_v61 = vadd.f32 %v4408_v6, %v1979_v38  ;;  %v2096_v10 = vmax.f32 %v1988_v31, 0.0 }
 0x52d   :  { %v2921_v43 = vpop.f32.mrf.mxu0 }
 0x52e   :  { %2962 = vmatprep.mubr.bf16.mxu1 %v2122_v8  ;;  %v1991_v11 = vadd.f32 %v2921_v43, %v4408_v6  ;;  %v2094_v34 = vmax.f32 %v1980_v61, 0.0 }
 0x52f   :  { %2963 = vmatmul.mubr.bf16.vlgmr.msra.gmra.mxu1 %v2123_v21  ;;  %v1982_v17 = vpop.f32.mrf.mxu0 }
 0x530   :  { %v1983_v0 = vadd.f32 %v4408_v6, %v1982_v17  ;;  %v2097_v58 = vmax.f32 %v1991_v11, 0.0 }
 0x531   :  { %v2924_v41 = vpop.f32.mrf.mxu0 }
 0x532   :  { %v2095_v51 = vmax.f32 %v1983_v0, 0.0  ;;  %v2125_v54 = vpack.c.bf16 %v2097_v58, %v2096_v10  ;;  %v2004_v29 = vadd.f32 %v2924_v41, %v4408_v6 }
 0x533   :  { %v1995_v23 = vpop.f32.mrf.mxu0 }
 0x534   :  { %v2124_v33 = vpack.c.bf16 %v2095_v51, %v2094_v34  ;;  %v1996_v47 = vadd.f32 %v4408_v6, %v1995_v23  ;;  %v2100_v19 = vmax.f32 %v2004_v29, 0.0 }
 0x535   :  { %v2925_v2 = vpop.f32.mrf.mxu0 }
 0x536   :  { %v2007_v49 = vadd.f32 %v2925_v2, %v4408_v6  ;;  %2966 = vmatprep.mubr.bf16.mxu1 %v2124_v33  ;;  %v2098_v50 = vmax.f32 %v1996_v47, 0.0 }
 0x537   :  { %v1998_v20 = vpop.f32.mrf.mxu0  ;;  %2967 = vmatmul.mubr.bf16.gmra.mxu1 %v2125_v54 }
 0x538   :  { %v1999_v30 = vadd.f32 %v4408_v6, %v1998_v20  ;;  %v2101_v14 = vmax.f32 %v2007_v49, 0.0 }
 0x539   :  { %v2928_v53 = vpop.f32.mrf.mxu0 }
 0x53a   :  { %v2099_v55 = vmax.f32 %v1999_v30, 0.0  ;;  %v2127_v18 = vpack.c.bf16 %v2101_v14, %v2100_v19  ;;  %v2020_v52 = vadd.f32 %v2928_v53, %v4408_v6 }
 0x53b   :  { %v2011_v27 = vpop.f32.mrf.mxu0 }
 0x53c   :  { %v2126_v15 = vpack.c.bf16 %v2099_v55, %v2098_v50  ;;  %v2012_v28 = vadd.f32 %v4408_v6, %v2011_v27  ;;  %v2104_v57 = vmax.f32 %v2020_v52, 0.0 }
 0x53d   :  { %v2929_v22 = vpop.f32.mrf.mxu0 }
 0x53e   :  { %v2023_v35 = vadd.f32 %v2929_v22, %v4408_v6  ;;  %2970 = vmatprep.mubr.bf16.mxu1 %v2126_v15  ;;  %v2102_v39 = vmax.f32 %v2012_v28, 0.0 }
 0x53f   :  { %v2014_v62 = vpop.f32.mrf.mxu0  ;;  %2971 = vmatmul.mubr.bf16.gmra.mxu1 %v2127_v18 }
 0x540   :  { %v2015_v4 = vadd.f32 %v4408_v6, %v2014_v62  ;;  %v2105_v32 = vmax.f32 %v2023_v35, 0.0 }
 0x541   :  { %v2932_v42 = vpop.f32.mrf.mxu0 }
 0x542   :  { %v2103_v48 = vmax.f32 %v2015_v4, 0.0  ;;  %v2129_v9 = vpack.c.bf16 %v2105_v32, %v2104_v57  ;;  %v2036_v13 = vadd.f32 %v2932_v42, %v4408_v6  ;;  %v4445_v4 = vld [vmem:[%s4495_s13] ss:$0 sm:$0xff]  ;;  %s3392_s13 = smov [#allocation8]  }
 0x543   :  { %v2027_v46 = vpop.f32.mrf.mxu0  ;;  %s2504_s2 = sshll.u32 %s3392_s13, 4  ;;  %s2505_s2 = int_to_ptr.vmem [resolvable:$true] %s2504_s2 }
 0x544   :  { %v2128_v1 = vpack.c.bf16 %v2103_v48, %v2102_v39  ;;  %v2028_v63 = vadd.f32 %v4408_v6, %v2027_v46  ;;  %v2108_v12 = vmax.f32 %v2036_v13, 0.0  ;;  %s3360_s26 = scalar_lea.vmem %s2505_s2, 4096  ;;  %p3365_p2 = scmp.lt.s32.totalorder %s2505_s2, %s2505_s2 }
 0x545   :  { %v2933_v36 = vpop.f32.mrf.mxu0  ;;  %p3361_p1 = scmp.ne.s32.totalorder %s2505_s2, %s3360_s26  ;;  %p3366_p3 = scmp.lt.s32.totalorder %s3360_s26, %s3360_s26 }
 0x546   :  { %v2039_v5 = vadd.f32 %v2933_v36, %v4408_v6  ;;  %2974 = vmatprep.mubr.bf16.mxu1 %v2128_v1  ;;  %v2106_v45 = vmax.f32 %v2028_v63, 0.0 }
 0x547   :  { %v2030_v26 = vpop.f32.mrf.mxu0  ;;  %2975 = vmatmul.mubr.bf16.gmra.mxu1 %v2129_v9  ;;  %p3367_p4 = por %p3366_p3, %p3365_p2 }
 0x548   :  { %v2031_v25 = vadd.f32 %v4408_v6, %v2030_v26  ;;  %v2109_v56 = vmax.f32 %v2039_v5, 0.0 }
 0x549   :  { %v2936_v3 = vpop.f32.mrf.mxu0  ;;  %p3368_p5 = pnand %p3367_p4, %p3361_p1 }
 0x54a   :  { %v2107_v60 = vmax.f32 %v2031_v25, 0.0  ;;  %v2131_v37 = vpack.c.bf16 %v2109_v56, %v2108_v12  ;;  %v2052_v7 = vadd.f32 %v2936_v3, %v4408_v6 }
 0x54b   :  { %v2043_v40 = vpop.f32.mrf.mxu0 }
 0x54c   :  { %v2130_v44 = vpack.c.bf16 %v2107_v60, %v2106_v45  ;;  %v2044_v16 = vadd.f32 %v4408_v6, %v2043_v40  ;;  %v2112_v31 = vmax.f32 %v2052_v7, 0.0 }
 0x54d   :  { %v2937_v24 = vpop.f32.mrf.mxu0 }
 0x54e   :  { %v2055_v59 = vadd.f32 %v2937_v24, %v4408_v6  ;;  %2978 = vmatprep.mubr.bf16.mxu1 %v2130_v44  ;;  %v2110_v61 = vmax.f32 %v2044_v16, 0.0 }
 0x54f   :  { %v2046_v38 = vpop.f32.mrf.mxu0  ;;  %2979 = vmatmul.mubr.bf16.gmra.mxu1 %v2131_v37 }
 0x550   :  { %v2047_v8 = vadd.f32 %v4408_v6, %v2046_v38  ;;  %v2113_v21 = vmax.f32 %v2055_v59, 0.0 }
 0x551   :  { %v2940_v43 = vpop.f32.mrf.mxu0 }
 0x552   :  { %v2111_v11 = vmax.f32 %v2047_v8, 0.0  ;;  %v2133_v58 = vpack.c.bf16 %v2113_v21, %v2112_v31  ;;  %v2068_v10 = vadd.f32 %v2940_v43, %v4408_v6 }
 0x553   :  { %v2059_v17 = vpop.f32.mrf.mxu0 }
 0x554   :  { %v2132_v0 = vpack.c.bf16 %v2111_v11, %v2110_v61  ;;  %v2060_v34 = vadd.f32 %v4408_v6, %v2059_v17  ;;  %v2116_v29 = vmax.f32 %v2068_v10, 0.0 }
 0x555   :  { %v2941_v41 = vpop.f32.mrf.mxu0 }
 0x556   :  { %v2071_v51 = vadd.f32 %v2941_v41, %v4408_v6  ;;  %2982 = vmatprep.mubr.bf16.mxu1 %v2132_v0  ;;  %v2114_v47 = vmax.f32 %v2060_v34, 0.0 }
 0x557   :  { %v2062_v23 = vpop.f32.mrf.mxu0  ;;  %2983 = vmatmul.mubr.bf16.gmra.mxu1 %v2133_v58 }
 0x558   :  { %v2063_v33 = vadd.f32 %v4408_v6, %v2062_v23  ;;  %v2117_v54 = vmax.f32 %v2071_v51, 0.0 }
 0x559   :  { %v2944_v2 = vpop.f32.mrf.mxu0 }
 0x55a   :  { %v2115_v49 = vmax.f32 %v2063_v33, 0.0  ;;  %v2135_v14 = vpack.c.bf16 %v2117_v54, %v2116_v29  ;;  %v2084_v19 = vadd.f32 %v2944_v2, %v4408_v6 }
 0x55b   :  { %v2075_v20 = vpop.f32.mrf.mxu0 }
 0x55c   :  { %v2134_v30 = vpack.c.bf16 %v2115_v49, %v2114_v47  ;;  %v2076_v50 = vadd.f32 %v4408_v6, %v2075_v20  ;;  %v2120_v35 = vmax.f32 %v2084_v19, 0.0 }
 0x55d   :  { %v2945_v53 = vpop.f32.mrf.mxu0 }
 0x55e   :  { %v2087_v55 = vadd.f32 %v2945_v53, %v4408_v6  ;;  %2986 = vmatprep.mubr.bf16.mxu1 %v2134_v30  ;;  %v2118_v22 = vmax.f32 %v2076_v50, 0.0 }
 0x55f   :  { %v2078_v27 = vpop.f32.mrf.mxu0  ;;  %2987 = vmatmul.mubr.bf16.gmra.mxu1 %v2135_v14 }
 0x560   :  { %v2079_v15 = vadd.f32 %v4408_v6, %v2078_v27  ;;  %v2121_v18 = vmax.f32 %v2087_v55, 0.0 }
 0x562   :  { %v2119_v28 = vmax.f32 %v2079_v15, 0.0  ;;  %v2137_v62 = vpack.c.bf16 %v2121_v18, %v2120_v35 }
 0x564   :  { %v2136_v52 = vpack.c.bf16 %v2119_v28, %v2118_v22 }
 0x566   :  { %2990 = vmatprep.mubr.bf16.mxu1 %v2136_v52 }
 0x567   :  { %2991 = vmatmul.mubr.bf16.gmra.mxu1 %v2137_v62 }
 0x5ef   :  { %v2964_v32 = vpop.f32.mrf.mxu1 }
 0x5f0   :  { %v2252_v42 = vadd.f32 %v2964_v32, %v4445_v4 }
 0x5f1   :  { %v2243_v39 = vpop.f32.mrf.mxu1 }
 0x5f2   :  { %3236 = vtanh.f32 %v2252_v42  ;;  %v2244_v6 = vadd.f32 %v4445_v4, %v2243_v39 }
 0x5f3   :  { %v2965_v48 = vpop.f32.mrf.mxu1 }
 0x5f4   :  { %3238 = vtanh.f32 %v2244_v6  ;;  %v2255_v57 = vadd.f32 %v2965_v48, %v4445_v4 }
 0x5f5   :  { %v2246_v46 = vpop.f32.mrf.mxu1 }
 0x5f6   :  { %3240 = vtanh.f32 %v2255_v57  ;;  %v2247_v1 = vadd.f32 %v4445_v4, %v2246_v46 }
 0x5f7   :  { %v2968_v9 = vpop.f32.mrf.mxu1 }
 0x5f8   :  { %3242 = vtanh.f32 %v2247_v1  ;;  %v2268_v36 = vadd.f32 %v2968_v9, %v4445_v4 }
 0x5f9   :  { %v2259_v63 = vpop.f32.mrf.mxu1 }
 0x5fa   :  { %3244 = vtanh.f32 %v2268_v36  ;;  %v2260_v5 = vadd.f32 %v4445_v4, %v2259_v63 }
 0x5fb   :  { %v2969_v13 = vpop.f32.mrf.mxu1 }
 0x5fc   :  { %3246 = vtanh.f32 %v2260_v5  ;;  %v2271_v26 = vadd.f32 %v2969_v13, %v4445_v4 }
 0x5fd   :  { %v2262_v25 = vpop.f32.mrf.mxu1 }
 0x5fe   :  { %3248 = vtanh.f32 %v2271_v26  ;;  %v2263_v56 = vadd.f32 %v4445_v4, %v2262_v25 }
 0x5ff   :  { %v3237_v3 = vpop.eup %3236  ;;  %v2972_v45 = vpop.f32.mrf.mxu1 }
 0x600   :  { %2404 = vst [vmem:[#allocation8 + $0x10] sm:$0xff] %v3237_v3  ;;  %3250 = vtanh.f32 %v2263_v56  ;;  %v2284_v60 = vadd.f32 %v2972_v45, %v4445_v4 }
 0x601   :  { %v3239_v12 = vpop.eup %3238  ;;  %v2275_v40 = vpop.f32.mrf.mxu1 }
 0x602   :  { %2402 = vst [vmem:[#allocation8] sm:$0xff] %v3239_v12  ;;  %3252 = vtanh.f32 %v2284_v60  ;;  %v2276_v44 = vadd.f32 %v4445_v4, %v2275_v40 }
 0x603   :  { %v3241_v37 = vpop.eup %3240  ;;  %v2973_v24 = vpop.f32.mrf.mxu1 }
 0x604   :  { %2405 = vst [vmem:[#allocation8 + $0x18] sm:$0xff] %v3241_v37  ;;  %3254 = vtanh.f32 %v2276_v44  ;;  %v2287_v16 = vadd.f32 %v2973_v24, %v4445_v4 }
 0x605   :  { %v3243_v59 = vpop.eup %3242  ;;  %v2278_v7 = vpop.f32.mrf.mxu1 }
 0x606   :  { %2403 = vst [vmem:[#allocation8 + $0x8] sm:$0xff] %v3243_v59  ;;  %3256 = vtanh.f32 %v2287_v16  ;;  %v2279_v38 = vadd.f32 %v4445_v4, %v2278_v7 }
 0x607   :  { %v3245_v8 = vpop.eup %3244  ;;  %v2976_v21 = vpop.f32.mrf.mxu1 }
 0x608   :  { %2408 = vst [vmem:[#allocation8 + $0x30] sm:$0xff] %v3245_v8  ;;  %3258 = vtanh.f32 %v2279_v38  ;;  %v2300_v43 = vadd.f32 %v2976_v21, %v4445_v4 }
 0x609   :  { %v3247_v61 = vpop.eup %3246  ;;  %v2291_v11 = vpop.f32.mrf.mxu1 }
 0x60a   :  { %2406 = vst [vmem:[#allocation8 + $0x20] sm:$0xff] %v3247_v61  ;;  %3260 = vtanh.f32 %v2300_v43  ;;  %v2292_v31 = vadd.f32 %v4445_v4, %v2291_v11 }
 0x60b   :  { %v3249_v17 = vpop.eup %3248  ;;  %v2977_v0 = vpop.f32.mrf.mxu1 }
 0x60c   :  { %2409 = vst [vmem:[#allocation8 + $0x38] sm:$0xff] %v3249_v17  ;;  %3262 = vtanh.f32 %v2292_v31  ;;  %v2303_v58 = vadd.f32 %v2977_v0, %v4445_v4 }
 0x60d   :  { %v3251_v41 = vpop.eup %3250  ;;  %v2294_v34 = vpop.f32.mrf.mxu1 }
 0x60e   :  { %2407 = vst [vmem:[#allocation8 + $0x28] sm:$0xff] %v3251_v41  ;;  %3264 = vtanh.f32 %v2303_v58  ;;  %v2295_v51 = vadd.f32 %v4445_v4, %v2294_v34 }
 0x60f   :  { %v3253_v10 = vpop.eup %3252  ;;  %v2980_v23 = vpop.f32.mrf.mxu1 }
 0x610   :  { %2412 = vst [vmem:[#allocation8 + $0x50] sm:$0xff] %v3253_v10  ;;  %3266 = vtanh.f32 %v2295_v51  ;;  %v2316_v33 = vadd.f32 %v2980_v23, %v4445_v4 }
 0x611   :  { %v3255_v54 = vpop.eup %3254  ;;  %v2307_v2 = vpop.f32.mrf.mxu1 }
 0x612   :  { %2410 = vst [vmem:[#allocation8 + $0x40] sm:$0xff] %v3255_v54  ;;  %3268 = vtanh.f32 %v2316_v33  ;;  %v2308_v47 = vadd.f32 %v4445_v4, %v2307_v2 }
 0x613   :  { %v3257_v49 = vpop.eup %3256  ;;  %v2981_v29 = vpop.f32.mrf.mxu1 }
 0x614   :  { %2413 = vst [vmem:[#allocation8 + $0x58] sm:$0xff] %v3257_v49  ;;  %3270 = vtanh.f32 %v2308_v47  ;;  %v2319_v20 = vadd.f32 %v2981_v29, %v4445_v4 }
 0x615   :  { %v3259_v30 = vpop.eup %3258  ;;  %v2310_v14 = vpop.f32.mrf.mxu1 }
 0x616   :  { %2411 = vst [vmem:[#allocation8 + $0x48] sm:$0xff] %v3259_v30  ;;  %3272 = vtanh.f32 %v2319_v20  ;;  %v2311_v53 = vadd.f32 %v4445_v4, %v2310_v14 }
 0x617   :  { %v3261_v50 = vpop.eup %3260  ;;  %v2984_v55 = vpop.f32.mrf.mxu1 }
 0x618   :  { %2416 = vst [vmem:[#allocation8 + $0x70] sm:$0xff] %v3261_v50  ;;  %3274 = vtanh.f32 %v2311_v53  ;;  %v2332_v19 = vadd.f32 %v2984_v55, %v4445_v4 }
 0x619   :  { %v3263_v27 = vpop.eup %3262  ;;  %v2323_v15 = vpop.f32.mrf.mxu1 }
 0x61a   :  { %2414 = vst [vmem:[#allocation8 + $0x60] sm:$0xff] %v3263_v27  ;;  %3276 = vtanh.f32 %v2332_v19  ;;  %v2324_v18 = vadd.f32 %v4445_v4, %v2323_v15 }
 0x61b   :  { %v3265_v22 = vpop.eup %3264  ;;  %v2985_v28 = vpop.f32.mrf.mxu1 }
 0x61c   :  { %2417 = vst [vmem:[#allocation8 + $0x78] sm:$0xff] %v3265_v22  ;;  %3278 = vtanh.f32 %v2324_v18  ;;  %v2335_v35 = vadd.f32 %v2985_v28, %v4445_v4 }
 0x61d   :  { %v3267_v52 = vpop.eup %3266  ;;  %v2326_v62 = vpop.f32.mrf.mxu1 }
 0x61e   :  { %2415 = vst [vmem:[#allocation8 + $0x68] sm:$0xff] %v3267_v52  ;;  %3280 = vtanh.f32 %v2335_v35  ;;  %v2327_v32 = vadd.f32 %v4445_v4, %v2326_v62 }
 0x61f   :  { %v3269_v42 = vpop.eup %3268  ;;  %v2988_v39 = vpop.f32.mrf.mxu1 }
 0x620   :  { %2420 = vst [vmem:[#allocation8 + $0x90] sm:$0xff] %v3269_v42  ;;  %3282 = vtanh.f32 %v2327_v32  ;;  %v2348_v6 = vadd.f32 %v2988_v39, %v4445_v4 }
 0x621   :  { %v3271_v48 = vpop.eup %3270  ;;  %v2339_v57 = vpop.f32.mrf.mxu1 }
 0x622   :  { %2418 = vst [vmem:[#allocation8 + $0x80] sm:$0xff] %v3271_v48  ;;  %3284 = vtanh.f32 %v2348_v6  ;;  %v2340_v46 = vadd.f32 %v4445_v4, %v2339_v57 }
 0x623   :  { %v3273_v1 = vpop.eup %3272  ;;  %v2989_v9 = vpop.f32.mrf.mxu1 }
 0x624   :  { %2421 = vst [vmem:[#allocation8 + $0x98] sm:$0xff] %v3273_v1  ;;  %3286 = vtanh.f32 %v2340_v46  ;;  %v2351_v36 = vadd.f32 %v2989_v9, %v4445_v4 }
 0x625   :  { %v3275_v63 = vpop.eup %3274  ;;  %v2342_v5 = vpop.f32.mrf.mxu1 }
 0x626   :  { %2419 = vst [vmem:[#allocation8 + $0x88] sm:$0xff] %v3275_v63  ;;  %3288 = vtanh.f32 %v2351_v36  ;;  %v2343_v13 = vadd.f32 %v4445_v4, %v2342_v5 }
 0x627   :  { %v3277_v26 = vpop.eup %3276  ;;  %v2992_v25 = vpop.f32.mrf.mxu1 }
 0x628   :  { %2424 = vst [vmem:[#allocation8 + $0xb0] sm:$0xff] %v3277_v26  ;;  %3290 = vtanh.f32 %v2343_v13  ;;  %v2364_v56 = vadd.f32 %v2992_v25, %v4445_v4 }
 0x629   :  { %v3279_v3 = vpop.eup %3278  ;;  %v2355_v45 = vpop.f32.mrf.mxu1 }
 0x62a   :  { %2422 = vst [vmem:[#allocation8 + $0xa0] sm:$0xff] %v3279_v3  ;;  %3292 = vtanh.f32 %v2364_v56  ;;  %v2356_v60 = vadd.f32 %v4445_v4, %v2355_v45 }
 0x62b   :  { %v3281_v12 = vpop.eup %3280  ;;  %v2993_v40 = vpop.f32.mrf.mxu1 }
 0x62c   :  { %2425 = vst [vmem:[#allocation8 + $0xb8] sm:$0xff] %v3281_v12  ;;  %3294 = vtanh.f32 %v2356_v60  ;;  %v2367_v44 = vadd.f32 %v2993_v40, %v4445_v4 }
 0x62d   :  { %v3283_v37 = vpop.eup %3282  ;;  %v2358_v24 = vpop.f32.mrf.mxu1 }
 0x62e   :  { %2423 = vst [vmem:[#allocation8 + $0xa8] sm:$0xff] %v3283_v37  ;;  %3296 = vtanh.f32 %v2367_v44  ;;  %v2359_v16 = vadd.f32 %v4445_v4, %v2358_v24 }
 0x62f   :  { %v3285_v59 = vpop.eup %3284 }
 0x630   :  { %2428 = vst [vmem:[#allocation8 + $0xd0] sm:$0xff] %v3285_v59  ;;  %3298 = vtanh.f32 %v2359_v16 }
 0x631   :  { %v3287_v7 = vpop.eup %3286 }
 0x632   :  { %2426 = vst [vmem:[#allocation8 + $0xc0] sm:$0xff] %v3287_v7 }
 0x633   :  { %v3289_v38 = vpop.eup %3288 }
 0x634   :  { %2429 = vst [vmem:[#allocation8 + $0xd8] sm:$0xff] %v3289_v38 }
 0x635   :  { %v3291_v8 = vpop.eup %3290 }
 0x636   :  { %2427 = vst [vmem:[#allocation8 + $0xc8] sm:$0xff] %v3291_v8 }
 0x637   :  { %v3293_v21 = vpop.eup %3292 }
 0x638   :  { %2432 = vst [vmem:[#allocation8 + $0xf0] sm:$0xff] %v3293_v21 }
 0x639   :  { %v3295_v43 = vpop.eup %3294 }
 0x63a   :  { %2430 = vst [vmem:[#allocation8 + $0xe0] sm:$0xff] %v3295_v43 }
 0x63b   :  { %v3297_v61 = vpop.eup %3296 }
 0x63c   :  { %2433 = vst [vmem:[#allocation8 + $0xf8] sm:$0xff] %v3297_v61 }
 0x63d   :  { %v3299_v11 = vpop.eup %3298 }
 0x63e   :  { %2431 = vst [vmem:[#allocation8 + $0xe8] sm:$0xff] %v3299_v11 }
 0x63f   :  { %3371 = shalt.err (!%p3368_p5)
}
 0x640   :  { %s3393_s27 = smov 128   ;;  %s3394_s28 = smov 8  }
 0x641   :  { %2510 = dma.vmem_to_hbm [thread:$0]  %s2505_s2, 4096, %s4496_s14, [#allocation4], %s3393_s27, %s3393_s27, %s3394_s28  }
 0x642   :  { %3384 = dma.done.wait [#allocation4], 4096  }
 0x643   :  { %3385 = vsyncadd [#allocation4], 4294963200 }
 0x644   :  { %2518 = vsyncpa [#allocation3], 1 }
 0x645   :  { %2519 = vsyncpa [#allocation6], 1 }
 0x646   :  { %2520 = vsyncpa [#allocation4], 1 }

</bundles_post_ra>
